<compile_context>
chip_gen: v7x
topology: tpu7x:2x2x1
jax: 0.10.0
libtpu: 0.0.40
codegen_flags: <defaults>
</compile_context>

<pallas_src>
import functools

import jax
import jax.numpy as jnp
from jax.experimental import pallas as pl
from jax.experimental.pallas import tpu as pltpu

# ------------------------- model hyper-parameters -------------------------
FEATURE_SIZE = 8
EDGE_DIM = 4
EMB = 16            # model_embedding_size
N_HEADS = 2         # model_attention_heads
GNN_LAYERS = 2      # model_gnn_layers
FC_LAYERS = 2       # model_fc_layers
DENSE = 32          # model_dense_neurons
DROPOUT = 0.1       # model_dropout_rate (unused: eval semantics)

_HC = N_HEADS * EMB


def _spec2(shape):
    # full-array 2-D block, trivial grid
    return pl.BlockSpec(shape, lambda i: (0, 0))


# ----------------------- fused GAT layer kernel ----------------------------
def _gat_layer_kernel(h_ref, ea_ref, src1h_ref, dst1h_ref, dst1h_t_ref,
                      wlr_ref, blr_ref, we_ref, attbd_ref, hmask_ref,
                      bias_ref, tw_ref, tb_ref, bng_ref, bnb_ref,
                      o_ref, *, num_heads, head_dim):
    f32 = jnp.float32
    hc = num_heads * head_dim

    hx = h_ref[...]                       # (N, Din)
    src1h = src1h_ref[...]                # (E, N) one-hot source incidence
    dst1h = dst1h_ref[...]                # (E, N) one-hot target incidence

    # Fused source/target projections: x @ [Wl | Wr] + [bl | br]  -> split lanes.
    xlr = jnp.dot(hx, wlr_ref[...], preferred_element_type=f32) + blr_ref[...]
    xl = xlr[:, :hc]                      # lin_l(x): source / value features (N, HC)
    xr = xlr[:, hc:]                      # lin_r(x): target features          (N, HC)
    ge = jnp.dot(ea_ref[...], we_ref[...], preferred_element_type=f32)   # (E, HC)

    # Per-edge endpoint gathers via one-hot matmuls (MXU).
    xl_src = jnp.dot(src1h, xl, preferred_element_type=f32)              # (E, HC)
    xr_dst = jnp.dot(dst1h, xr, preferred_element_type=f32)              # (E, HC)

    m = xl_src + xr_dst + ge
    m = jnp.where(m > 0, m, 0.2 * m)                                     # leaky_relu(0.2)
    # Per-head logits in one matmul with the block-diagonal attention matrix.
    logits = jnp.dot(m, attbd_ref[...], preferred_element_type=f32)      # (E, H)

    hmask = hmask_ref[...]                                               # (H, HC)
    alpha_full = jnp.zeros((src1h.shape[0], hc), f32)                    # (E, HC)
    neg_big = f32(-1e9)
    for hh in range(num_heads):
        lg = logits[:, hh:hh + 1]                                        # (E, 1)
        masked = jnp.where(dst1h > 0, lg, neg_big)                       # (E, N)
        mx = jnp.max(masked, axis=0, keepdims=True)                      # per-target max
        p = jnp.exp(masked - mx) * dst1h                                 # (E, N)
        denom = jnp.sum(p, axis=0, keepdims=True)                        # (1, N)
        # each edge hits exactly one target column -> pick its alpha
        a_e = jnp.sum(p / jnp.maximum(denom, f32(1e-16)),
                      axis=1, keepdims=True)                             # (E, 1)
        alpha_full = alpha_full + a_e * hmask[hh:hh + 1, :]              # (E, HC)

    # Scatter-aggregate to targets: out[dst] = sum_e alpha_e * lin_l(x_src)
    agg = jnp.dot(dst1h_t_ref[...], alpha_full * xl_src,
                  preferred_element_type=f32) + bias_ref[...]            # (N, HC)

    # transf Linear + ReLU
    y = jnp.dot(agg, tw_ref[...], preferred_element_type=f32) + tb_ref[...]
    y = jnp.maximum(y, 0.0)

    # BatchNorm1d with batch statistics (training-mode normalization)
    mean = jnp.mean(y, axis=0, keepdims=True)
    var = jnp.mean(jnp.square(y - mean), axis=0, keepdims=True)
    o_ref[...] = (y - mean) * jax.lax.rsqrt(var + 1e-5) * bng_ref[...] + bnb_ref[...]


def gat_layer(h, ea, src1h, dst1h, dst1h_t, lp):
    n = h.shape[0]
    args = (h, ea, src1h, dst1h, dst1h_t,
            lp['wlr'], lp['blr'], lp['we'], lp['att_bd'], lp['hmask'],
            lp['bias'], lp['tw'], lp['tb'], lp['bng'], lp['bnb'])
    return pl.pallas_call(
        functools.partial(_gat_layer_kernel, num_heads=N_HEADS, head_dim=EMB),
        out_shape=jax.ShapeDtypeStruct((n, EMB), jnp.float32),
        grid=(1,),
        in_specs=[_spec2(a.shape) for a in args],
        out_specs=_spec2((n, EMB)),
        compiler_params=pltpu.CompilerParams(dimension_semantics=("arbitrary",)),
    )(*args)


# ------------------------- fused head kernel --------------------------------
def _head_kernel(*refs, n_fc):
    (h_ref, segng_ref, seggn_ref, chg_ref,
     gw_ref, gb_ref, w1x_ref, w1c_ref, b1_ref) = refs[:9]
    rest = refs[9:]
    f32 = jnp.float32

    hx = h_ref[...]                                                      # (N, EMB)
    segng = segng_ref[...]                                               # (N, G) selected-node membership

    # AttentionalAggregation over selected nodes, per graph.
    gate = jnp.dot(hx, gw_ref[...], preferred_element_type=f32) + gb_ref[...]  # (N, 1)
    masked = jnp.where(segng > 0, gate, f32(-1e9))                       # (N, G)
    mx = jnp.max(masked, axis=0, keepdims=True)                          # (1, G)
    p = jnp.exp(masked - mx) * segng
    denom = jnp.sum(p, axis=0, keepdims=True)                            # (1, G)
    a_n = jnp.sum(p / jnp.maximum(denom, f32(1e-16)),
                  axis=1, keepdims=True)                                 # (N, 1)
    pooled = jnp.dot(seggn_ref[...], a_n * hx,
                     preferred_element_type=f32)                         # (G, EMB)

    # linear1 on [pooled | mol_charge | center_charge] without an explicit concat
    z = (jnp.dot(pooled, w1x_ref[...], preferred_element_type=f32)
         + jnp.dot(chg_ref[...], w1c_ref[...], preferred_element_type=f32)
         + b1_ref[...])
    z = jnp.maximum(z, 0.0)
    # TODO(synk): F.dropout (and GAT alpha dropout) treated as identity (eval).
    for i in range(n_fc):
        w = rest[2 * i][...]
        b = rest[2 * i + 1][...]
        z = jnp.maximum(jnp.dot(z, w, preferred_element_type=f32) + b, 0.0)
    ow = rest[2 * n_fc][...]
    ob = rest[2 * n_fc + 1][...]
    o_ref = rest[2 * n_fc + 2]
    o_ref[...] = jnp.dot(z, ow, preferred_element_type=f32) + ob


def head(h, seg_ng, seg_gn, chg, params):
    g = seg_gn.shape[0]
    n_fc = len(params['fc_w'])
    args = [h, seg_ng, seg_gn, chg,
            params['gate_w'], params['gate_b'],
            params['lin1_wx'], params['lin1_wc'], params['lin1_b']]
    for w, b in zip(params['fc_w'], params['fc_b']):
        args += [w, b]
    args += [params['out_w'], params['out_b']]
    return pl.pallas_call(
        functools.partial(_head_kernel, n_fc=n_fc),
        out_shape=jax.ShapeDtypeStruct((g, 1), jnp.float32),
        grid=(1,),
        in_specs=[_spec2(a.shape) for a in args],
        out_specs=_spec2((g, 1)),
        compiler_params=pltpu.CompilerParams(dimension_semantics=("arbitrary",)),
    )(*args)


# ------------------------------ parameters ---------------------------------
def init_params(key):
    keys = iter(jax.random.split(key, 64))

    def nrm(shape, scale=0.1):
        return (scale * jax.random.normal(next(keys), shape)).astype(jnp.float32)

    hc = _HC
    # head-block mask: hmask[h, k] = 1 iff lane k belongs to head h
    hmask = (jnp.arange(hc)[None, :] // EMB ==
             jnp.arange(N_HEADS)[:, None]).astype(jnp.float32)           # (H, HC)

    gat = []
    in_dim = FEATURE_SIZE
    for _ in range(GNN_LAYERS):
        wl = nrm((in_dim, hc)); bl = nrm((hc,))
        wr = nrm((in_dim, hc)); br = nrm((hc,))
        att = nrm((N_HEADS, EMB))
        gat.append(dict(
            wlr=jnp.concatenate([wl, wr], axis=1),                       # (in, 2*HC)
            blr=jnp.concatenate([bl, br]).reshape(1, 2 * hc),
            we=nrm((EDGE_DIM, hc)),                                      # lin_edge (no bias)
            att_bd=hmask.T * att.reshape(-1)[:, None],                   # (HC, H) block-diag
            hmask=hmask,
            bias=nrm((hc,)).reshape(1, hc),
            tw=nrm((hc, EMB)),
            tb=nrm((EMB,)).reshape(1, EMB),
            bng=jnp.ones((1, EMB), jnp.float32),
            bnb=jnp.zeros((1, EMB), jnp.float32),
        ))
        in_dim = EMB

    lin1_w = nrm((EMB + 2, DENSE))
    params = dict(
        gat=gat,
        gate_w=nrm((EMB, 1)), gate_b=nrm((1,)).reshape(1, 1),
        lin1_wx=lin1_w[:EMB], lin1_wc=lin1_w[EMB:],
        lin1_b=nrm((DENSE,)).reshape(1, DENSE),
    )
    fc_w, fc_b = [], []
    dn = DENSE
    for _ in range(FC_LAYERS - 1):
        fc_w.append(nrm((dn, dn // 4)))
        fc_b.append(nrm((dn // 4,)).reshape(1, dn // 4))
        dn = dn // 4
    params['fc_w'], params['fc_b'] = fc_w, fc_b
    params['out_w'] = nrm((dn, 1))
    params['out_b'] = nrm((1,)).reshape(1, 1)
    return params


# -------------------------------- forward ----------------------------------
def gnn_forward(params, x, edge_index, edge_attr, node_index,
                mol_formal_charge, center_formal_charge, batch_index):
    n = x.shape[0]
    num_graphs = mol_formal_charge.shape[0]
    src, dst = edge_index[0], edge_index[1]

    # add_self_loops(fill_value='mean') as done inside GATv2Conv
    ea_sum = jnp.zeros((n, edge_attr.shape[1]), jnp.float32).at[dst].add(edge_attr)
    ea_cnt = jnp.zeros((n,), jnp.float32).at[dst].add(1.0)
    loop_attr = ea_sum / jnp.maximum(ea_cnt, 1.0)[:, None]
    src_f = jnp.concatenate([src, jnp.arange(n, dtype=src.dtype)])
    dst_f = jnp.concatenate([dst, jnp.arange(n, dtype=dst.dtype)])
    ea = jnp.concatenate([edge_attr.astype(jnp.float32), loop_attr], axis=0)

    # One-hot incidence matrices; edges stay in list form (duplicates are
    # separate softmax terms, matching PyG).
    node_ids = jnp.arange(n)
    src1h = (src_f[:, None] == node_ids[None, :]).astype(jnp.float32)    # (E, N)
    dst1h = (dst_f[:, None] == node_ids[None, :]).astype(jnp.float32)    # (E, N)
    dst1h_t = dst1h.T                                                    # (N, E)

    h = x.astype(jnp.float32)
    for i in range(GNN_LAYERS):
        h = gat_layer(h, ea, src1h, dst1h, dst1h_t, params['gat'][i])

    # node selection folded into the pooling mask
    sel = jnp.zeros((n,), bool).at[node_index].set(True)
    seg_ng = (sel[:, None] &
              (batch_index[:, None] == jnp.arange(num_graphs)[None, :])
              ).astype(jnp.float32)                                      # (N, G)
    seg_gn = seg_ng.T                                                    # (G, N)
    chg = jnp.stack([mol_formal_charge, center_formal_charge],
                    axis=1).astype(jnp.float32)                          # (G, 2)

    return head(h, seg_ng, seg_gn, chg, params)


# ----------------------------------- main -----------------------------------
if __name__ == "__main__":
    key = jax.random.PRNGKey(0)
    kp, kx, ke, kc1, kc2 = jax.random.split(key, 5)
    params = init_params(kp)

    num_nodes = 12                    # 2 graphs x 6 nodes
    x = jax.random.normal(kx, (num_nodes, FEATURE_SIZE), jnp.float32)

    # bidirectional ring edges inside each graph
    s0 = jnp.arange(6, dtype=jnp.int32)
    d0 = (s0 + 1) % 6
    src = jnp.concatenate([s0, d0, s0 + 6, d0 + 6])
    dst = jnp.concatenate([d0, s0, d0 + 6, s0 + 6])
    edge_index = jnp.stack([src, dst]).astype(jnp.int32)        # (2, 24)
    edge_attr = jax.random.normal(ke, (edge_index.shape[1], EDGE_DIM), jnp.float32)

    node_index = jnp.array([0, 2, 3, 5, 6, 8, 9, 11], dtype=jnp.int32)
    batch_index = jnp.array([0] * 6 + [1] * 6, dtype=jnp.int32)
    mol_formal_charge = jax.random.normal(kc1, (2,), jnp.float32)
    center_formal_charge = jax.random.normal(kc2, (2,), jnp.float32)

    fwd = jax.jit(gnn_forward)
    out = fwd(params, x, edge_index, edge_attr, node_index,
              mol_formal_charge, center_formal_charge, batch_index)
    out = jax.block_until_ready(out)
    assert out.shape == (2, 1), out.shape
    print("KERNEL_OK")
</pallas_src>

<mosaic_0001>
module attributes {stable_mosaic.version = 11 : i64} {
  func.func @_gat_layer_kernel(%arg0: i32, %arg1: memref<12x8xf32, #tpu.memory_space<vmem>>, %arg2: memref<36x4xf32, #tpu.memory_space<vmem>>, %arg3: memref<36x12xf32, #tpu.memory_space<vmem>>, %arg4: memref<36x12xf32, #tpu.memory_space<vmem>>, %arg5: memref<12x36xf32, #tpu.memory_space<vmem>>, %arg6: memref<8x64xf32, #tpu.memory_space<vmem>>, %arg7: memref<1x64xf32, #tpu.memory_space<vmem>>, %arg8: memref<4x32xf32, #tpu.memory_space<vmem>>, %arg9: memref<32x2xf32, #tpu.memory_space<vmem>>, %arg10: memref<2x32xf32, #tpu.memory_space<vmem>>, %arg11: memref<1x32xf32, #tpu.memory_space<vmem>>, %arg12: memref<32x16xf32, #tpu.memory_space<vmem>>, %arg13: memref<1x16xf32, #tpu.memory_space<vmem>>, %arg14: memref<1x16xf32, #tpu.memory_space<vmem>>, %arg15: memref<1x16xf32, #tpu.memory_space<vmem>>, %arg16: memref<12x16xf32, #tpu.memory_space<vmem>>) attributes {dimension_semantics = [#tpu.dimension_semantics<arbitrary>], iteration_bounds = array<i64: 1>, scalar_prefetch = 0 : i64, scratch_operands = 0 : i64, tpu.core_type = #tpu.core_type<tc>, window_params = [{pipeline_mode = #tpu.pipeline_mode<synchronous>, transform_indices = @transform_0, window_bounds = array<i64: 12, 8>}, {pipeline_mode = #tpu.pipeline_mode<synchronous>, transform_indices = @transform_1, window_bounds = array<i64: 36, 4>}, {pipeline_mode = #tpu.pipeline_mode<synchronous>, transform_indices = @transform_2, window_bounds = array<i64: 36, 12>}, {pipeline_mode = #tpu.pipeline_mode<synchronous>, transform_indices = @transform_3, window_bounds = array<i64: 36, 12>}, {pipeline_mode = #tpu.pipeline_mode<synchronous>, transform_indices = @transform_4, window_bounds = array<i64: 12, 36>}, {pipeline_mode = #tpu.pipeline_mode<synchronous>, transform_indices = @transform_5, window_bounds = array<i64: 8, 64>}, {pipeline_mode = #tpu.pipeline_mode<synchronous>, transform_indices = @transform_6, window_bounds = array<i64: 1, 64>}, {pipeline_mode = #tpu.pipeline_mode<synchronous>, transform_indices = @transform_7, window_bounds = array<i64: 4, 32>}, {pipeline_mode = #tpu.pipeline_mode<synchronous>, transform_indices = @transform_8, window_bounds = array<i64: 32, 2>}, {pipeline_mode = #tpu.pipeline_mode<synchronous>, transform_indices = @transform_9, window_bounds = array<i64: 2, 32>}, {pipeline_mode = #tpu.pipeline_mode<synchronous>, transform_indices = @transform_10, window_bounds = array<i64: 1, 32>}, {pipeline_mode = #tpu.pipeline_mode<synchronous>, transform_indices = @transform_11, window_bounds = array<i64: 32, 16>}, {pipeline_mode = #tpu.pipeline_mode<synchronous>, transform_indices = @transform_12, window_bounds = array<i64: 1, 16>}, {pipeline_mode = #tpu.pipeline_mode<synchronous>, transform_indices = @transform_13, window_bounds = array<i64: 1, 16>}, {pipeline_mode = #tpu.pipeline_mode<synchronous>, transform_indices = @transform_14, window_bounds = array<i64: 1, 16>}, {pipeline_mode = #tpu.pipeline_mode<synchronous>, transform_indices = @transform_15, window_bounds = array<i64: 12, 16>}]} {
    %c0 = arith.constant 0 : index
    %c0_0 = arith.constant 0 : index
    %0 = vector.load %arg1[%c0, %c0_0] : memref<12x8xf32, #tpu.memory_space<vmem>>, vector<12x8xf32>
    %c0_1 = arith.constant 0 : index
    %c0_2 = arith.constant 0 : index
    %1 = vector.load %arg3[%c0_1, %c0_2] : memref<36x12xf32, #tpu.memory_space<vmem>>, vector<36x12xf32>
    %c0_3 = arith.constant 0 : index
    %c0_4 = arith.constant 0 : index
    %2 = vector.load %arg4[%c0_3, %c0_4] : memref<36x12xf32, #tpu.memory_space<vmem>>, vector<36x12xf32>
    %c0_5 = arith.constant 0 : index
    %c0_6 = arith.constant 0 : index
    %3 = vector.load %arg6[%c0_5, %c0_6] : memref<8x64xf32, #tpu.memory_space<vmem>>, vector<8x64xf32>
    %cst = arith.constant dense<0.000000e+00> : vector<12x64xf32>
    %4 = tpu.matmul %0, %3, %cst {dimension_numbers = #tpu.dot_dimension_numbers<[1], [0], [0], [1], [0, 0, 1, 1], [], []>} : vector<12x8xf32>, vector<8x64xf32>, vector<12x64xf32> -> vector<12x64xf32>
    %c0_7 = arith.constant 0 : index
    %c0_8 = arith.constant 0 : index
    %5 = vector.load %arg7[%c0_7, %c0_8] : memref<1x64xf32, #tpu.memory_space<vmem>>, vector<1x64xf32>
    %6 = vector.broadcast %5 : vector<1x64xf32> to vector<12x64xf32>
    %7 = arith.addf %4, %6 : vector<12x64xf32>
    %8 = vector.extract_strided_slice %7 {offsets = [0, 0], sizes = [12, 32], strides = [1, 1]} : vector<12x64xf32> to vector<12x32xf32>
    %9 = vector.extract_strided_slice %7 {offsets = [0, 32], sizes = [12, 32], strides = [1, 1]} : vector<12x64xf32> to vector<12x32xf32>
    %c0_9 = arith.constant 0 : index
    %c0_10 = arith.constant 0 : index
    %10 = vector.load %arg2[%c0_9, %c0_10] : memref<36x4xf32, #tpu.memory_space<vmem>>, vector<36x4xf32>
    %c0_11 = arith.constant 0 : index
    %c0_12 = arith.constant 0 : index
    %11 = vector.load %arg8[%c0_11, %c0_12] : memref<4x32xf32, #tpu.memory_space<vmem>>, vector<4x32xf32>
    %cst_13 = arith.constant dense<0.000000e+00> : vector<36x32xf32>
    %12 = tpu.matmul %10, %11, %cst_13 {dimension_numbers = #tpu.dot_dimension_numbers<[1], [0], [0], [1], [0, 0, 1, 1], [], []>} : vector<36x4xf32>, vector<4x32xf32>, vector<36x32xf32> -> vector<36x32xf32>
    %cst_14 = arith.constant dense<0.000000e+00> : vector<36x32xf32>
    %13 = tpu.matmul %1, %8, %cst_14 {dimension_numbers = #tpu.dot_dimension_numbers<[1], [0], [0], [1], [0, 0, 1, 1], [], []>} : vector<36x12xf32>, vector<12x32xf32>, vector<36x32xf32> -> vector<36x32xf32>
    %cst_15 = arith.constant dense<0.000000e+00> : vector<36x32xf32>
    %14 = tpu.matmul %2, %9, %cst_15 {dimension_numbers = #tpu.dot_dimension_numbers<[1], [0], [0], [1], [0, 0, 1, 1], [], []>} : vector<36x12xf32>, vector<12x32xf32>, vector<36x32xf32> -> vector<36x32xf32>
    %15 = arith.addf %13, %14 : vector<36x32xf32>
    %16 = arith.addf %15, %12 : vector<36x32xf32>
    %cst_16 = arith.constant 0.000000e+00 : f32
    %17 = vector.broadcast %cst_16 : f32 to vector<36x32xf32>
    %18 = arith.cmpf ogt, %16, %17 : vector<36x32xf32>
    %cst_17 = arith.constant 2.000000e-01 : f32
    %19 = vector.broadcast %cst_17 : f32 to vector<36x32xf32>
    %20 = arith.mulf %19, %16 : vector<36x32xf32>
    %21 = arith.select %18, %16, %20 : vector<36x32xi1>, vector<36x32xf32>
    %c0_18 = arith.constant 0 : index
    %c0_19 = arith.constant 0 : index
    %22 = vector.load %arg9[%c0_18, %c0_19] : memref<32x2xf32, #tpu.memory_space<vmem>>, vector<32x2xf32>
    %cst_20 = arith.constant dense<0.000000e+00> : vector<36x2xf32>
    %23 = tpu.matmul %21, %22, %cst_20 {dimension_numbers = #tpu.dot_dimension_numbers<[1], [0], [0], [1], [0, 0, 1, 1], [], []>} : vector<36x32xf32>, vector<32x2xf32>, vector<36x2xf32> -> vector<36x2xf32>
    %c0_21 = arith.constant 0 : index
    %c0_22 = arith.constant 0 : index
    %24 = vector.load %arg10[%c0_21, %c0_22] : memref<2x32xf32, #tpu.memory_space<vmem>>, vector<2x32xf32>
    %cst_23 = arith.constant 0.000000e+00 : f32
    %25 = vector.broadcast %cst_23 : f32 to vector<36x32xf32>
    %26 = vector.extract_strided_slice %23 {offsets = [0, 0], sizes = [36, 1], strides = [1, 1]} : vector<36x2xf32> to vector<36x1xf32>
    %cst_24 = arith.constant 0.000000e+00 : f32
    %27 = vector.broadcast %cst_24 : f32 to vector<36x12xf32>
    %28 = arith.cmpf ogt, %2, %27 : vector<36x12xf32>
    %cst_25 = arith.constant -1.000000e+09 : f32
    %29 = vector.shape_cast %26 : vector<36x1xf32> to vector<36x1xf32>
    %30 = vector.broadcast %29 : vector<36x1xf32> to vector<36x12xf32>
    %31 = vector.broadcast %cst_25 : f32 to vector<36x12xf32>
    %32 = arith.select %28, %30, %31 : vector<36x12xi1>, vector<36x12xf32>
    %cst_26 = arith.constant dense<0xFF800000> : vector<12xf32>
    %33 = vector.multi_reduction <maximumf>, %32, %cst_26 [0] : vector<36x12xf32> to vector<12xf32>
    %34 = vector.shape_cast %33 : vector<12xf32> to vector<1x12xf32>
    %35 = vector.broadcast %34 : vector<1x12xf32> to vector<36x12xf32>
    %36 = arith.subf %32, %35 : vector<36x12xf32>
    %37 = math.exp %36 : vector<36x12xf32>
    %38 = arith.mulf %37, %2 : vector<36x12xf32>
    %cst_27 = arith.constant dense<0.000000e+00> : vector<12xf32>
    %39 = vector.multi_reduction <add>, %38, %cst_27 [0] : vector<36x12xf32> to vector<12xf32>
    %40 = vector.shape_cast %39 : vector<12xf32> to vector<1x12xf32>
    %cst_28 = arith.constant 1.000000e-16 : f32
    %41 = vector.broadcast %cst_28 : f32 to vector<1x12xf32>
    %42 = arith.maximumf %40, %41 : vector<1x12xf32>
    %43 = vector.broadcast %42 : vector<1x12xf32> to vector<36x12xf32>
    %44 = arith.divf %38, %43 : vector<36x12xf32>
    %cst_29 = arith.constant dense<0.000000e+00> : vector<36xf32>
    %45 = vector.multi_reduction <add>, %44, %cst_29 [1] : vector<36x12xf32> to vector<36xf32>
    %46 = vector.shape_cast %45 : vector<36xf32> to vector<36x1xf32>
    %47 = vector.extract_strided_slice %24 {offsets = [0, 0], sizes = [1, 32], strides = [1, 1]} : vector<2x32xf32> to vector<1x32xf32>
    %48 = vector.broadcast %46 : vector<36x1xf32> to vector<36x32xf32>
    %49 = vector.broadcast %47 : vector<1x32xf32> to vector<36x32xf32>
    %50 = arith.mulf %48, %49 : vector<36x32xf32>
    %51 = arith.addf %25, %50 : vector<36x32xf32>
    %52 = vector.extract_strided_slice %23 {offsets = [0, 1], sizes = [36, 1], strides = [1, 1]} : vector<36x2xf32> to vector<36x1xf32>
    %cst_30 = arith.constant 0.000000e+00 : f32
    %53 = vector.broadcast %cst_30 : f32 to vector<36x12xf32>
    %54 = arith.cmpf ogt, %2, %53 : vector<36x12xf32>
    %cst_31 = arith.constant -1.000000e+09 : f32
    %55 = vector.shape_cast %52 : vector<36x1xf32> to vector<36x1xf32>
    %56 = vector.broadcast %55 : vector<36x1xf32> to vector<36x12xf32>
    %57 = vector.broadcast %cst_31 : f32 to vector<36x12xf32>
    %58 = arith.select %54, %56, %57 : vector<36x12xi1>, vector<36x12xf32>
    %cst_32 = arith.constant dense<0xFF800000> : vector<12xf32>
    %59 = vector.multi_reduction <maximumf>, %58, %cst_32 [0] : vector<36x12xf32> to vector<12xf32>
    %60 = vector.shape_cast %59 : vector<12xf32> to vector<1x12xf32>
    %61 = vector.broadcast %60 : vector<1x12xf32> to vector<36x12xf32>
    %62 = arith.subf %58, %61 : vector<36x12xf32>
    %63 = math.exp %62 : vector<36x12xf32>
    %64 = arith.mulf %63, %2 : vector<36x12xf32>
    %cst_33 = arith.constant dense<0.000000e+00> : vector<12xf32>
    %65 = vector.multi_reduction <add>, %64, %cst_33 [0] : vector<36x12xf32> to vector<12xf32>
    %66 = vector.shape_cast %65 : vector<12xf32> to vector<1x12xf32>
    %cst_34 = arith.constant 1.000000e-16 : f32
    %67 = vector.broadcast %cst_34 : f32 to vector<1x12xf32>
    %68 = arith.maximumf %66, %67 : vector<1x12xf32>
    %69 = vector.broadcast %68 : vector<1x12xf32> to vector<36x12xf32>
    %70 = arith.divf %64, %69 : vector<36x12xf32>
    %cst_35 = arith.constant dense<0.000000e+00> : vector<36xf32>
    %71 = vector.multi_reduction <add>, %70, %cst_35 [1] : vector<36x12xf32> to vector<36xf32>
    %72 = vector.shape_cast %71 : vector<36xf32> to vector<36x1xf32>
    %73 = vector.extract_strided_slice %24 {offsets = [1, 0], sizes = [1, 32], strides = [1, 1]} : vector<2x32xf32> to vector<1x32xf32>
    %74 = vector.broadcast %72 : vector<36x1xf32> to vector<36x32xf32>
    %75 = vector.broadcast %73 : vector<1x32xf32> to vector<36x32xf32>
    %76 = arith.mulf %74, %75 : vector<36x32xf32>
    %77 = arith.addf %51, %76 : vector<36x32xf32>
    %c0_36 = arith.constant 0 : index
    %c0_37 = arith.constant 0 : index
    %78 = vector.load %arg5[%c0_36, %c0_37] : memref<12x36xf32, #tpu.memory_space<vmem>>, vector<12x36xf32>
    %79 = arith.mulf %77, %13 : vector<36x32xf32>
    %cst_38 = arith.constant dense<0.000000e+00> : vector<12x32xf32>
    %80 = tpu.matmul %78, %79, %cst_38 {dimension_numbers = #tpu.dot_dimension_numbers<[1], [0], [0], [1], [0, 0, 1, 1], [], []>} : vector<12x36xf32>, vector<36x32xf32>, vector<12x32xf32> -> vector<12x32xf32>
    %c0_39 = arith.constant 0 : index
    %c0_40 = arith.constant 0 : index
    %81 = vector.load %arg11[%c0_39, %c0_40] : memref<1x32xf32, #tpu.memory_space<vmem>>, vector<1x32xf32>
    %82 = vector.broadcast %81 : vector<1x32xf32> to vector<12x32xf32>
    %83 = arith.addf %80, %82 : vector<12x32xf32>
    %c0_41 = arith.constant 0 : index
    %c0_42 = arith.constant 0 : index
    %84 = vector.load %arg12[%c0_41, %c0_42] : memref<32x16xf32, #tpu.memory_space<vmem>>, vector<32x16xf32>
    %cst_43 = arith.constant dense<0.000000e+00> : vector<12x16xf32>
    %85 = tpu.matmul %83, %84, %cst_43 {dimension_numbers = #tpu.dot_dimension_numbers<[1], [0], [0], [1], [0, 0, 1, 1], [], []>} : vector<12x32xf32>, vector<32x16xf32>, vector<12x16xf32> -> vector<12x16xf32>
    %c0_44 = arith.constant 0 : index
    %c0_45 = arith.constant 0 : index
    %86 = vector.load %arg13[%c0_44, %c0_45] : memref<1x16xf32, #tpu.memory_space<vmem>>, vector<1x16xf32>
    %87 = vector.broadcast %86 : vector<1x16xf32> to vector<12x16xf32>
    %88 = arith.addf %85, %87 : vector<12x16xf32>
    %cst_46 = arith.constant 0.000000e+00 : f32
    %89 = vector.broadcast %cst_46 : f32 to vector<12x16xf32>
    %90 = arith.maximumf %88, %89 : vector<12x16xf32>
    %cst_47 = arith.constant dense<0.000000e+00> : vector<16xf32>
    %91 = vector.multi_reduction <add>, %90, %cst_47 [0] : vector<12x16xf32> to vector<16xf32>
    %92 = vector.shape_cast %91 : vector<16xf32> to vector<1x16xf32>
    %cst_48 = arith.constant 1.200000e+01 : f32
    %93 = vector.broadcast %cst_48 : f32 to vector<1x16xf32>
    %94 = arith.divf %92, %93 : vector<1x16xf32>
    %95 = vector.broadcast %94 : vector<1x16xf32> to vector<12x16xf32>
    %96 = arith.subf %90, %95 : vector<12x16xf32>
    %97 = arith.mulf %96, %96 : vector<12x16xf32>
    %cst_49 = arith.constant dense<0.000000e+00> : vector<16xf32>
    %98 = vector.multi_reduction <add>, %97, %cst_49 [0] : vector<12x16xf32> to vector<16xf32>
    %99 = vector.shape_cast %98 : vector<16xf32> to vector<1x16xf32>
    %cst_50 = arith.constant 1.200000e+01 : f32
    %100 = vector.broadcast %cst_50 : f32 to vector<1x16xf32>
    %101 = arith.divf %99, %100 : vector<1x16xf32>
    %102 = vector.broadcast %94 : vector<1x16xf32> to vector<12x16xf32>
    %103 = arith.subf %90, %102 : vector<12x16xf32>
    %cst_51 = arith.constant 9.99999974E-6 : f32
    %104 = vector.broadcast %cst_51 : f32 to vector<1x16xf32>
    %105 = arith.addf %101, %104 : vector<1x16xf32>
    %106 = math.rsqrt %105 : vector<1x16xf32>
    %107 = vector.broadcast %106 : vector<1x16xf32> to vector<12x16xf32>
    %108 = arith.mulf %103, %107 : vector<12x16xf32>
    %c0_52 = arith.constant 0 : index
    %c0_53 = arith.constant 0 : index
    %109 = vector.load %arg14[%c0_52, %c0_53] : memref<1x16xf32, #tpu.memory_space<vmem>>, vector<1x16xf32>
    %110 = vector.broadcast %109 : vector<1x16xf32> to vector<12x16xf32>
    %111 = arith.mulf %108, %110 : vector<12x16xf32>
    %c0_54 = arith.constant 0 : index
    %c0_55 = arith.constant 0 : index
    %112 = vector.load %arg15[%c0_54, %c0_55] : memref<1x16xf32, #tpu.memory_space<vmem>>, vector<1x16xf32>
    %113 = vector.broadcast %112 : vector<1x16xf32> to vector<12x16xf32>
    %114 = arith.addf %111, %113 : vector<12x16xf32>
    %c0_56 = arith.constant 0 : index
    %c0_57 = arith.constant 0 : index
    %115 = vector.load %arg16[%c0_56, %c0_57] : memref<12x16xf32, #tpu.memory_space<vmem>>, vector<12x16xf32>
    tpu.vector_store %arg16[%c0_56, %c0_57], %114 {strides = array<i32>} : memref<12x16xf32, #tpu.memory_space<vmem>>, vector<12x16xf32>,
    return
  }
  func.func @transform_0(%arg0: i32) -> (i32, i32) {
    %c0_i32 = arith.constant 0 : i32
    %c0_i32_0 = arith.constant 0 : i32
    %c0_i32_1 = arith.constant 0 : i32
    return %c0_i32, %c0_i32_0 : i32, i32
  }
  func.func @transform_1(%arg0: i32) -> (i32, i32) {
    %c0_i32 = arith.constant 0 : i32
    %c0_i32_0 = arith.constant 0 : i32
    %c0_i32_1 = arith.constant 0 : i32
    return %c0_i32, %c0_i32_0 : i32, i32
  }
  func.func @transform_2(%arg0: i32) -> (i32, i32) {
    %c0_i32 = arith.constant 0 : i32
    %c0_i32_0 = arith.constant 0 : i32
    %c0_i32_1 = arith.constant 0 : i32
    return %c0_i32, %c0_i32_0 : i32, i32
  }
  func.func @transform_3(%arg0: i32) -> (i32, i32) {
    %c0_i32 = arith.constant 0 : i32
    %c0_i32_0 = arith.constant 0 : i32
    %c0_i32_1 = arith.constant 0 : i32
    return %c0_i32, %c0_i32_0 : i32, i32
  }
  func.func @transform_4(%arg0: i32) -> (i32, i32) {
    %c0_i32 = arith.constant 0 : i32
    %c0_i32_0 = arith.constant 0 : i32
    %c0_i32_1 = arith.constant 0 : i32
    return %c0_i32, %c0_i32_0 : i32, i32
  }
  func.func @transform_5(%arg0: i32) -> (i32, i32) {
    %c0_i32 = arith.constant 0 : i32
    %c0_i32_0 = arith.constant 0 : i32
    %c0_i32_1 = arith.constant 0 : i32
    return %c0_i32, %c0_i32_0 : i32, i32
  }
  func.func @transform_6(%arg0: i32) -> (i32, i32) {
    %c0_i32 = arith.constant 0 : i32
    %c0_i32_0 = arith.constant 0 : i32
    %c0_i32_1 = arith.constant 0 : i32
    return %c0_i32, %c0_i32_0 : i32, i32
  }
  func.func @transform_7(%arg0: i32) -> (i32, i32) {
    %c0_i32 = arith.constant 0 : i32
    %c0_i32_0 = arith.constant 0 : i32
    %c0_i32_1 = arith.constant 0 : i32
    return %c0_i32, %c0_i32_0 : i32, i32
  }
  func.func @transform_8(%arg0: i32) -> (i32, i32) {
    %c0_i32 = arith.constant 0 : i32
    %c0_i32_0 = arith.constant 0 : i32
    %c0_i32_1 = arith.constant 0 : i32
    return %c0_i32, %c0_i32_0 : i32, i32
  }
  func.func @transform_9(%arg0: i32) -> (i32, i32) {
    %c0_i32 = arith.constant 0 : i32
    %c0_i32_0 = arith.constant 0 : i32
    %c0_i32_1 = arith.constant 0 : i32
    return %c0_i32, %c0_i32_0 : i32, i32
  }
  func.func @transform_10(%arg0: i32) -> (i32, i32) {
    %c0_i32 = arith.constant 0 : i32
    %c0_i32_0 = arith.constant 0 : i32
    %c0_i32_1 = arith.constant 0 : i32
    return %c0_i32, %c0_i32_0 : i32, i32
  }
  func.func @transform_11(%arg0: i32) -> (i32, i32) {
    %c0_i32 = arith.constant 0 : i32
    %c0_i32_0 = arith.constant 0 : i32
    %c0_i32_1 = arith.constant 0 : i32
    return %c0_i32, %c0_i32_0 : i32, i32
  }
  func.func @transform_12(%arg0: i32) -> (i32, i32) {
    %c0_i32 = arith.constant 0 : i32
    %c0_i32_0 = arith.constant 0 : i32
    %c0_i32_1 = arith.constant 0 : i32
    return %c0_i32, %c0_i32_0 : i32, i32
  }
  func.func @transform_13(%arg0: i32) -> (i32, i32) {
    %c0_i32 = arith.constant 0 : i32
    %c0_i32_0 = arith.constant 0 : i32
    %c0_i32_1 = arith.constant 0 : i32
    return %c0_i32, %c0_i32_0 : i32, i32
  }
  func.func @transform_14(%arg0: i32) -> (i32, i32) {
    %c0_i32 = arith.constant 0 : i32
    %c0_i32_0 = arith.constant 0 : i32
    %c0_i32_1 = arith.constant 0 : i32
    return %c0_i32, %c0_i32_0 : i32, i32
  }
  func.func @transform_15(%arg0: i32) -> (i32, i32) {
    %c0_i32 = arith.constant 0 : i32
    %c0_i32_0 = arith.constant 0 : i32
    %c0_i32_1 = arith.constant 0 : i32
    return %c0_i32, %c0_i32_0 : i32, i32
  }
}

module attributes {stable_mosaic.version = 11 : i64} {
  func.func @_gat_layer_kernel(%arg0: i32, %arg1: memref<12x16xf32, #tpu.memory_space<vmem>>, %arg2: memref<36x4xf32, #tpu.memory_space<vmem>>, %arg3: memref<36x12xf32, #tpu.memory_space<vmem>>, %arg4: memref<36x12xf32, #tpu.memory_space<vmem>>, %arg5: memref<12x36xf32, #tpu.memory_space<vmem>>, %arg6: memref<16x64xf32, #tpu.memory_space<vmem>>, %arg7: memref<1x64xf32, #tpu.memory_space<vmem>>, %arg8: memref<4x32xf32, #tpu.memory_space<vmem>>, %arg9: memref<32x2xf32, #tpu.memory_space<vmem>>, %arg10: memref<2x32xf32, #tpu.memory_space<vmem>>, %arg11: memref<1x32xf32, #tpu.memory_space<vmem>>, %arg12: memref<32x16xf32, #tpu.memory_space<vmem>>, %arg13: memref<1x16xf32, #tpu.memory_space<vmem>>, %arg14: memref<1x16xf32, #tpu.memory_space<vmem>>, %arg15: memref<1x16xf32, #tpu.memory_space<vmem>>, %arg16: memref<12x16xf32, #tpu.memory_space<vmem>>) attributes {dimension_semantics = [#tpu.dimension_semantics<arbitrary>], iteration_bounds = array<i64: 1>, scalar_prefetch = 0 : i64, scratch_operands = 0 : i64, tpu.core_type = #tpu.core_type<tc>, window_params = [{pipeline_mode = #tpu.pipeline_mode<synchronous>, transform_indices = @transform_0, window_bounds = array<i64: 12, 16>}, {pipeline_mode = #tpu.pipeline_mode<synchronous>, transform_indices = @transform_1, window_bounds = array<i64: 36, 4>}, {pipeline_mode = #tpu.pipeline_mode<synchronous>, transform_indices = @transform_2, window_bounds = array<i64: 36, 12>}, {pipeline_mode = #tpu.pipeline_mode<synchronous>, transform_indices = @transform_3, window_bounds = array<i64: 36, 12>}, {pipeline_mode = #tpu.pipeline_mode<synchronous>, transform_indices = @transform_4, window_bounds = array<i64: 12, 36>}, {pipeline_mode = #tpu.pipeline_mode<synchronous>, transform_indices = @transform_5, window_bounds = array<i64: 16, 64>}, {pipeline_mode = #tpu.pipeline_mode<synchronous>, transform_indices = @transform_6, window_bounds = array<i64: 1, 64>}, {pipeline_mode = #tpu.pipeline_mode<synchronous>, transform_indices = @transform_7, window_bounds = array<i64: 4, 32>}, {pipeline_mode = #tpu.pipeline_mode<synchronous>, transform_indices = @transform_8, window_bounds = array<i64: 32, 2>}, {pipeline_mode = #tpu.pipeline_mode<synchronous>, transform_indices = @transform_9, window_bounds = array<i64: 2, 32>}, {pipeline_mode = #tpu.pipeline_mode<synchronous>, transform_indices = @transform_10, window_bounds = array<i64: 1, 32>}, {pipeline_mode = #tpu.pipeline_mode<synchronous>, transform_indices = @transform_11, window_bounds = array<i64: 32, 16>}, {pipeline_mode = #tpu.pipeline_mode<synchronous>, transform_indices = @transform_12, window_bounds = array<i64: 1, 16>}, {pipeline_mode = #tpu.pipeline_mode<synchronous>, transform_indices = @transform_13, window_bounds = array<i64: 1, 16>}, {pipeline_mode = #tpu.pipeline_mode<synchronous>, transform_indices = @transform_14, window_bounds = array<i64: 1, 16>}, {pipeline_mode = #tpu.pipeline_mode<synchronous>, transform_indices = @transform_15, window_bounds = array<i64: 12, 16>}]} {
    %c0 = arith.constant 0 : index
    %c0_0 = arith.constant 0 : index
    %0 = vector.load %arg1[%c0, %c0_0] : memref<12x16xf32, #tpu.memory_space<vmem>>, vector<12x16xf32>
    %c0_1 = arith.constant 0 : index
    %c0_2 = arith.constant 0 : index
    %1 = vector.load %arg3[%c0_1, %c0_2] : memref<36x12xf32, #tpu.memory_space<vmem>>, vector<36x12xf32>
    %c0_3 = arith.constant 0 : index
    %c0_4 = arith.constant 0 : index
    %2 = vector.load %arg4[%c0_3, %c0_4] : memref<36x12xf32, #tpu.memory_space<vmem>>, vector<36x12xf32>
    %c0_5 = arith.constant 0 : index
    %c0_6 = arith.constant 0 : index
    %3 = vector.load %arg6[%c0_5, %c0_6] : memref<16x64xf32, #tpu.memory_space<vmem>>, vector<16x64xf32>
    %cst = arith.constant dense<0.000000e+00> : vector<12x64xf32>
    %4 = tpu.matmul %0, %3, %cst {dimension_numbers = #tpu.dot_dimension_numbers<[1], [0], [0], [1], [0, 0, 1, 1], [], []>} : vector<12x16xf32>, vector<16x64xf32>, vector<12x64xf32> -> vector<12x64xf32>
    %c0_7 = arith.constant 0 : index
    %c0_8 = arith.constant 0 : index
    %5 = vector.load %arg7[%c0_7, %c0_8] : memref<1x64xf32, #tpu.memory_space<vmem>>, vector<1x64xf32>
    %6 = vector.broadcast %5 : vector<1x64xf32> to vector<12x64xf32>
    %7 = arith.addf %4, %6 : vector<12x64xf32>
    %8 = vector.extract_strided_slice %7 {offsets = [0, 0], sizes = [12, 32], strides = [1, 1]} : vector<12x64xf32> to vector<12x32xf32>
    %9 = vector.extract_strided_slice %7 {offsets = [0, 32], sizes = [12, 32], strides = [1, 1]} : vector<12x64xf32> to vector<12x32xf32>
    %c0_9 = arith.constant 0 : index
    %c0_10 = arith.constant 0 : index
    %10 = vector.load %arg2[%c0_9, %c0_10] : memref<36x4xf32, #tpu.memory_space<vmem>>, vector<36x4xf32>
    %c0_11 = arith.constant 0 : index
    %c0_12 = arith.constant 0 : index
    %11 = vector.load %arg8[%c0_11, %c0_12] : memref<4x32xf32, #tpu.memory_space<vmem>>, vector<4x32xf32>
    %cst_13 = arith.constant dense<0.000000e+00> : vector<36x32xf32>
    %12 = tpu.matmul %10, %11, %cst_13 {dimension_numbers = #tpu.dot_dimension_numbers<[1], [0], [0], [1], [0, 0, 1, 1], [], []>} : vector<36x4xf32>, vector<4x32xf32>, vector<36x32xf32> -> vector<36x32xf32>
    %cst_14 = arith.constant dense<0.000000e+00> : vector<36x32xf32>
    %13 = tpu.matmul %1, %8, %cst_14 {dimension_numbers = #tpu.dot_dimension_numbers<[1], [0], [0], [1], [0, 0, 1, 1], [], []>} : vector<36x12xf32>, vector<12x32xf32>, vector<36x32xf32> -> vector<36x32xf32>
    %cst_15 = arith.constant dense<0.000000e+00> : vector<36x32xf32>
    %14 = tpu.matmul %2, %9, %cst_15 {dimension_numbers = #tpu.dot_dimension_numbers<[1], [0], [0], [1], [0, 0, 1, 1], [], []>} : vector<36x12xf32>, vector<12x32xf32>, vector<36x32xf32> -> vector<36x32xf32>
    %15 = arith.addf %13, %14 : vector<36x32xf32>
    %16 = arith.addf %15, %12 : vector<36x32xf32>
    %cst_16 = arith.constant 0.000000e+00 : f32
    %17 = vector.broadcast %cst_16 : f32 to vector<36x32xf32>
    %18 = arith.cmpf ogt, %16, %17 : vector<36x32xf32>
    %cst_17 = arith.constant 2.000000e-01 : f32
    %19 = vector.broadcast %cst_17 : f32 to vector<36x32xf32>
    %20 = arith.mulf %19, %16 : vector<36x32xf32>
    %21 = arith.select %18, %16, %20 : vector<36x32xi1>, vector<36x32xf32>
    %c0_18 = arith.constant 0 : index
    %c0_19 = arith.constant 0 : index
    %22 = vector.load %arg9[%c0_18, %c0_19] : memref<32x2xf32, #tpu.memory_space<vmem>>, vector<32x2xf32>
    %cst_20 = arith.constant dense<0.000000e+00> : vector<36x2xf32>
    %23 = tpu.matmul %21, %22, %cst_20 {dimension_numbers = #tpu.dot_dimension_numbers<[1], [0], [0], [1], [0, 0, 1, 1], [], []>} : vector<36x32xf32>, vector<32x2xf32>, vector<36x2xf32> -> vector<36x2xf32>
    %c0_21 = arith.constant 0 : index
    %c0_22 = arith.constant 0 : index
    %24 = vector.load %arg10[%c0_21, %c0_22] : memref<2x32xf32, #tpu.memory_space<vmem>>, vector<2x32xf32>
    %cst_23 = arith.constant 0.000000e+00 : f32
    %25 = vector.broadcast %cst_23 : f32 to vector<36x32xf32>
    %26 = vector.extract_strided_slice %23 {offsets = [0, 0], sizes = [36, 1], strides = [1, 1]} : vector<36x2xf32> to vector<36x1xf32>
    %cst_24 = arith.constant 0.000000e+00 : f32
    %27 = vector.broadcast %cst_24 : f32 to vector<36x12xf32>
    %28 = arith.cmpf ogt, %2, %27 : vector<36x12xf32>
    %cst_25 = arith.constant -1.000000e+09 : f32
    %29 = vector.shape_cast %26 : vector<36x1xf32> to vector<36x1xf32>
    %30 = vector.broadcast %29 : vector<36x1xf32> to vector<36x12xf32>
    %31 = vector.broadcast %cst_25 : f32 to vector<36x12xf32>
    %32 = arith.select %28, %30, %31 : vector<36x12xi1>, vector<36x12xf32>
    %cst_26 = arith.constant dense<0xFF800000> : vector<12xf32>
    %33 = vector.multi_reduction <maximumf>, %32, %cst_26 [0] : vector<36x12xf32> to vector<12xf32>
    %34 = vector.shape_cast %33 : vector<12xf32> to vector<1x12xf32>
    %35 = vector.broadcast %34 : vector<1x12xf32> to vector<36x12xf32>
    %36 = arith.subf %32, %35 : vector<36x12xf32>
    %37 = math.exp %36 : vector<36x12xf32>
    %38 = arith.mulf %37, %2 : vector<36x12xf32>
    %cst_27 = arith.constant dense<0.000000e+00> : vector<12xf32>
    %39 = vector.multi_reduction <add>, %38, %cst_27 [0] : vector<36x12xf32> to vector<12xf32>
    %40 = vector.shape_cast %39 : vector<12xf32> to vector<1x12xf32>
    %cst_28 = arith.constant 1.000000e-16 : f32
    %41 = vector.broadcast %cst_28 : f32 to vector<1x12xf32>
    %42 = arith.maximumf %40, %41 : vector<1x12xf32>
    %43 = vector.broadcast %42 : vector<1x12xf32> to vector<36x12xf32>
    %44 = arith.divf %38, %43 : vector<36x12xf32>
    %cst_29 = arith.constant dense<0.000000e+00> : vector<36xf32>
    %45 = vector.multi_reduction <add>, %44, %cst_29 [1] : vector<36x12xf32> to vector<36xf32>
    %46 = vector.shape_cast %45 : vector<36xf32> to vector<36x1xf32>
    %47 = vector.extract_strided_slice %24 {offsets = [0, 0], sizes = [1, 32], strides = [1, 1]} : vector<2x32xf32> to vector<1x32xf32>
    %48 = vector.broadcast %46 : vector<36x1xf32> to vector<36x32xf32>
    %49 = vector.broadcast %47 : vector<1x32xf32> to vector<36x32xf32>
    %50 = arith.mulf %48, %49 : vector<36x32xf32>
    %51 = arith.addf %25, %50 : vector<36x32xf32>
    %52 = vector.extract_strided_slice %23 {offsets = [0, 1], sizes = [36, 1], strides = [1, 1]} : vector<36x2xf32> to vector<36x1xf32>
    %cst_30 = arith.constant 0.000000e+00 : f32
    %53 = vector.broadcast %cst_30 : f32 to vector<36x12xf32>
    %54 = arith.cmpf ogt, %2, %53 : vector<36x12xf32>
    %cst_31 = arith.constant -1.000000e+09 : f32
    %55 = vector.shape_cast %52 : vector<36x1xf32> to vector<36x1xf32>
    %56 = vector.broadcast %55 : vector<36x1xf32> to vector<36x12xf32>
    %57 = vector.broadcast %cst_31 : f32 to vector<36x12xf32>
    %58 = arith.select %54, %56, %57 : vector<36x12xi1>, vector<36x12xf32>
    %cst_32 = arith.constant dense<0xFF800000> : vector<12xf32>
    %59 = vector.multi_reduction <maximumf>, %58, %cst_32 [0] : vector<36x12xf32> to vector<12xf32>
    %60 = vector.shape_cast %59 : vector<12xf32> to vector<1x12xf32>
    %61 = vector.broadcast %60 : vector<1x12xf32> to vector<36x12xf32>
    %62 = arith.subf %58, %61 : vector<36x12xf32>
    %63 = math.exp %62 : vector<36x12xf32>
    %64 = arith.mulf %63, %2 : vector<36x12xf32>
    %cst_33 = arith.constant dense<0.000000e+00> : vector<12xf32>
    %65 = vector.multi_reduction <add>, %64, %cst_33 [0] : vector<36x12xf32> to vector<12xf32>
    %66 = vector.shape_cast %65 : vector<12xf32> to vector<1x12xf32>
    %cst_34 = arith.constant 1.000000e-16 : f32
    %67 = vector.broadcast %cst_34 : f32 to vector<1x12xf32>
    %68 = arith.maximumf %66, %67 : vector<1x12xf32>
    %69 = vector.broadcast %68 : vector<1x12xf32> to vector<36x12xf32>
    %70 = arith.divf %64, %69 : vector<36x12xf32>
    %cst_35 = arith.constant dense<0.000000e+00> : vector<36xf32>
    %71 = vector.multi_reduction <add>, %70, %cst_35 [1] : vector<36x12xf32> to vector<36xf32>
    %72 = vector.shape_cast %71 : vector<36xf32> to vector<36x1xf32>
    %73 = vector.extract_strided_slice %24 {offsets = [1, 0], sizes = [1, 32], strides = [1, 1]} : vector<2x32xf32> to vector<1x32xf32>
    %74 = vector.broadcast %72 : vector<36x1xf32> to vector<36x32xf32>
    %75 = vector.broadcast %73 : vector<1x32xf32> to vector<36x32xf32>
    %76 = arith.mulf %74, %75 : vector<36x32xf32>
    %77 = arith.addf %51, %76 : vector<36x32xf32>
    %c0_36 = arith.constant 0 : index
    %c0_37 = arith.constant 0 : index
    %78 = vector.load %arg5[%c0_36, %c0_37] : memref<12x36xf32, #tpu.memory_space<vmem>>, vector<12x36xf32>
    %79 = arith.mulf %77, %13 : vector<36x32xf32>
    %cst_38 = arith.constant dense<0.000000e+00> : vector<12x32xf32>
    %80 = tpu.matmul %78, %79, %cst_38 {dimension_numbers = #tpu.dot_dimension_numbers<[1], [0], [0], [1], [0, 0, 1, 1], [], []>} : vector<12x36xf32>, vector<36x32xf32>, vector<12x32xf32> -> vector<12x32xf32>
    %c0_39 = arith.constant 0 : index
    %c0_40 = arith.constant 0 : index
    %81 = vector.load %arg11[%c0_39, %c0_40] : memref<1x32xf32, #tpu.memory_space<vmem>>, vector<1x32xf32>
    %82 = vector.broadcast %81 : vector<1x32xf32> to vector<12x32xf32>
    %83 = arith.addf %80, %82 : vector<12x32xf32>
    %c0_41 = arith.constant 0 : index
    %c0_42 = arith.constant 0 : index
    %84 = vector.load %arg12[%c0_41, %c0_42] : memref<32x16xf32, #tpu.memory_space<vmem>>, vector<32x16xf32>
    %cst_43 = arith.constant dense<0.000000e+00> : vector<12x16xf32>
    %85 = tpu.matmul %83, %84, %cst_43 {dimension_numbers = #tpu.dot_dimension_numbers<[1], [0], [0], [1], [0, 0, 1, 1], [], []>} : vector<12x32xf32>, vector<32x16xf32>, vector<12x16xf32> -> vector<12x16xf32>
    %c0_44 = arith.constant 0 : index
    %c0_45 = arith.constant 0 : index
    %86 = vector.load %arg13[%c0_44, %c0_45] : memref<1x16xf32, #tpu.memory_space<vmem>>, vector<1x16xf32>
    %87 = vector.broadcast %86 : vector<1x16xf32> to vector<12x16xf32>
    %88 = arith.addf %85, %87 : vector<12x16xf32>
    %cst_46 = arith.constant 0.000000e+00 : f32
    %89 = vector.broadcast %cst_46 : f32 to vector<12x16xf32>
    %90 = arith.maximumf %88, %89 : vector<12x16xf32>
    %cst_47 = arith.constant dense<0.000000e+00> : vector<16xf32>
    %91 = vector.multi_reduction <add>, %90, %cst_47 [0] : vector<12x16xf32> to vector<16xf32>
    %92 = vector.shape_cast %91 : vector<16xf32> to vector<1x16xf32>
    %cst_48 = arith.constant 1.200000e+01 : f32
    %93 = vector.broadcast %cst_48 : f32 to vector<1x16xf32>
    %94 = arith.divf %92, %93 : vector<1x16xf32>
    %95 = vector.broadcast %94 : vector<1x16xf32> to vector<12x16xf32>
    %96 = arith.subf %90, %95 : vector<12x16xf32>
    %97 = arith.mulf %96, %96 : vector<12x16xf32>
    %cst_49 = arith.constant dense<0.000000e+00> : vector<16xf32>
    %98 = vector.multi_reduction <add>, %97, %cst_49 [0] : vector<12x16xf32> to vector<16xf32>
    %99 = vector.shape_cast %98 : vector<16xf32> to vector<1x16xf32>
    %cst_50 = arith.constant 1.200000e+01 : f32
    %100 = vector.broadcast %cst_50 : f32 to vector<1x16xf32>
    %101 = arith.divf %99, %100 : vector<1x16xf32>
    %102 = vector.broadcast %94 : vector<1x16xf32> to vector<12x16xf32>
    %103 = arith.subf %90, %102 : vector<12x16xf32>
    %cst_51 = arith.constant 9.99999974E-6 : f32
    %104 = vector.broadcast %cst_51 : f32 to vector<1x16xf32>
    %105 = arith.addf %101, %104 : vector<1x16xf32>
    %106 = math.rsqrt %105 : vector<1x16xf32>
    %107 = vector.broadcast %106 : vector<1x16xf32> to vector<12x16xf32>
    %108 = arith.mulf %103, %107 : vector<12x16xf32>
    %c0_52 = arith.constant 0 : index
    %c0_53 = arith.constant 0 : index
    %109 = vector.load %arg14[%c0_52, %c0_53] : memref<1x16xf32, #tpu.memory_space<vmem>>, vector<1x16xf32>
    %110 = vector.broadcast %109 : vector<1x16xf32> to vector<12x16xf32>
    %111 = arith.mulf %108, %110 : vector<12x16xf32>
    %c0_54 = arith.constant 0 : index
    %c0_55 = arith.constant 0 : index
    %112 = vector.load %arg15[%c0_54, %c0_55] : memref<1x16xf32, #tpu.memory_space<vmem>>, vector<1x16xf32>
    %113 = vector.broadcast %112 : vector<1x16xf32> to vector<12x16xf32>
    %114 = arith.addf %111, %113 : vector<12x16xf32>
    %c0_56 = arith.constant 0 : index
    %c0_57 = arith.constant 0 : index
    %115 = vector.load %arg16[%c0_56, %c0_57] : memref<12x16xf32, #tpu.memory_space<vmem>>, vector<12x16xf32>
    tpu.vector_store %arg16[%c0_56, %c0_57], %114 {strides = array<i32>} : memref<12x16xf32, #tpu.memory_space<vmem>>, vector<12x16xf32>,
    return
  }
  func.func @transform_0(%arg0: i32) -> (i32, i32) {
    %c0_i32 = arith.constant 0 : i32
    %c0_i32_0 = arith.constant 0 : i32
    %c0_i32_1 = arith.constant 0 : i32
    return %c0_i32, %c0_i32_0 : i32, i32
  }
  func.func @transform_1(%arg0: i32) -> (i32, i32) {
    %c0_i32 = arith.constant 0 : i32
    %c0_i32_0 = arith.constant 0 : i32
    %c0_i32_1 = arith.constant 0 : i32
    return %c0_i32, %c0_i32_0 : i32, i32
  }
  func.func @transform_2(%arg0: i32) -> (i32, i32) {
    %c0_i32 = arith.constant 0 : i32
    %c0_i32_0 = arith.constant 0 : i32
    %c0_i32_1 = arith.constant 0 : i32
    return %c0_i32, %c0_i32_0 : i32, i32
  }
  func.func @transform_3(%arg0: i32) -> (i32, i32) {
    %c0_i32 = arith.constant 0 : i32
    %c0_i32_0 = arith.constant 0 : i32
    %c0_i32_1 = arith.constant 0 : i32
    return %c0_i32, %c0_i32_0 : i32, i32
  }
  func.func @transform_4(%arg0: i32) -> (i32, i32) {
    %c0_i32 = arith.constant 0 : i32
    %c0_i32_0 = arith.constant 0 : i32
    %c0_i32_1 = arith.constant 0 : i32
    return %c0_i32, %c0_i32_0 : i32, i32
  }
  func.func @transform_5(%arg0: i32) -> (i32, i32) {
    %c0_i32 = arith.constant 0 : i32
    %c0_i32_0 = arith.constant 0 : i32
    %c0_i32_1 = arith.constant 0 : i32
    return %c0_i32, %c0_i32_0 : i32, i32
  }
  func.func @transform_6(%arg0: i32) -> (i32, i32) {
    %c0_i32 = arith.constant 0 : i32
    %c0_i32_0 = arith.constant 0 : i32
    %c0_i32_1 = arith.constant 0 : i32
    return %c0_i32, %c0_i32_0 : i32, i32
  }
  func.func @transform_7(%arg0: i32) -> (i32, i32) {
    %c0_i32 = arith.constant 0 : i32
    %c0_i32_0 = arith.constant 0 : i32
    %c0_i32_1 = arith.constant 0 : i32
    return %c0_i32, %c0_i32_0 : i32, i32
  }
  func.func @transform_8(%arg0: i32) -> (i32, i32) {
    %c0_i32 = arith.constant 0 : i32
    %c0_i32_0 = arith.constant 0 : i32
    %c0_i32_1 = arith.constant 0 : i32
    return %c0_i32, %c0_i32_0 : i32, i32
  }
  func.func @transform_9(%arg0: i32) -> (i32, i32) {
    %c0_i32 = arith.constant 0 : i32
    %c0_i32_0 = arith.constant 0 : i32
    %c0_i32_1 = arith.constant 0 : i32
    return %c0_i32, %c0_i32_0 : i32, i32
  }
  func.func @transform_10(%arg0: i32) -> (i32, i32) {
    %c0_i32 = arith.constant 0 : i32
    %c0_i32_0 = arith.constant 0 : i32
    %c0_i32_1 = arith.constant 0 : i32
    return %c0_i32, %c0_i32_0 : i32, i32
  }
  func.func @transform_11(%arg0: i32) -> (i32, i32) {
    %c0_i32 = arith.constant 0 : i32
    %c0_i32_0 = arith.constant 0 : i32
    %c0_i32_1 = arith.constant 0 : i32
    return %c0_i32, %c0_i32_0 : i32, i32
  }
  func.func @transform_12(%arg0: i32) -> (i32, i32) {
    %c0_i32 = arith.constant 0 : i32
    %c0_i32_0 = arith.constant 0 : i32
    %c0_i32_1 = arith.constant 0 : i32
    return %c0_i32, %c0_i32_0 : i32, i32
  }
  func.func @transform_13(%arg0: i32) -> (i32, i32) {
    %c0_i32 = arith.constant 0 : i32
    %c0_i32_0 = arith.constant 0 : i32
    %c0_i32_1 = arith.constant 0 : i32
    return %c0_i32, %c0_i32_0 : i32, i32
  }
  func.func @transform_14(%arg0: i32) -> (i32, i32) {
    %c0_i32 = arith.constant 0 : i32
    %c0_i32_0 = arith.constant 0 : i32
    %c0_i32_1 = arith.constant 0 : i32
    return %c0_i32, %c0_i32_0 : i32, i32
  }
  func.func @transform_15(%arg0: i32) -> (i32, i32) {
    %c0_i32 = arith.constant 0 : i32
    %c0_i32_0 = arith.constant 0 : i32
    %c0_i32_1 = arith.constant 0 : i32
    return %c0_i32, %c0_i32_0 : i32, i32
  }
}

module attributes {stable_mosaic.version = 11 : i64} {
  func.func @_head_kernel(%arg0: i32, %arg1: memref<12x16xf32, #tpu.memory_space<vmem>>, %arg2: memref<12x2xf32, #tpu.memory_space<vmem>>, %arg3: memref<2x12xf32, #tpu.memory_space<vmem>>, %arg4: memref<2x2xf32, #tpu.memory_space<vmem>>, %arg5: memref<16x1xf32, #tpu.memory_space<vmem>>, %arg6: memref<1x1xf32, #tpu.memory_space<vmem>>, %arg7: memref<16x32xf32, #tpu.memory_space<vmem>>, %arg8: memref<2x32xf32, #tpu.memory_space<vmem>>, %arg9: memref<1x32xf32, #tpu.memory_space<vmem>>, %arg10: memref<32x8xf32, #tpu.memory_space<vmem>>, %arg11: memref<1x8xf32, #tpu.memory_space<vmem>>, %arg12: memref<8x1xf32, #tpu.memory_space<vmem>>, %arg13: memref<1x1xf32, #tpu.memory_space<vmem>>, %arg14: memref<2x1xf32, #tpu.memory_space<vmem>>) attributes {dimension_semantics = [#tpu.dimension_semantics<arbitrary>], iteration_bounds = array<i64: 1>, scalar_prefetch = 0 : i64, scratch_operands = 0 : i64, tpu.core_type = #tpu.core_type<tc>, window_params = [{pipeline_mode = #tpu.pipeline_mode<synchronous>, transform_indices = @transform_0, window_bounds = array<i64: 12, 16>}, {pipeline_mode = #tpu.pipeline_mode<synchronous>, transform_indices = @transform_1, window_bounds = array<i64: 12, 2>}, {pipeline_mode = #tpu.pipeline_mode<synchronous>, transform_indices = @transform_2, window_bounds = array<i64: 2, 12>}, {pipeline_mode = #tpu.pipeline_mode<synchronous>, transform_indices = @transform_3, window_bounds = array<i64: 2, 2>}, {pipeline_mode = #tpu.pipeline_mode<synchronous>, transform_indices = @transform_4, window_bounds = array<i64: 16, 1>}, {pipeline_mode = #tpu.pipeline_mode<synchronous>, transform_indices = @transform_5, window_bounds = array<i64: 1, 1>}, {pipeline_mode = #tpu.pipeline_mode<synchronous>, transform_indices = @transform_6, window_bounds = array<i64: 16, 32>}, {pipeline_mode = #tpu.pipeline_mode<synchronous>, transform_indices = @transform_7, window_bounds = array<i64: 2, 32>}, {pipeline_mode = #tpu.pipeline_mode<synchronous>, transform_indices = @transform_8, window_bounds = array<i64: 1, 32>}, {pipeline_mode = #tpu.pipeline_mode<synchronous>, transform_indices = @transform_9, window_bounds = array<i64: 32, 8>}, {pipeline_mode = #tpu.pipeline_mode<synchronous>, transform_indices = @transform_10, window_bounds = array<i64: 1, 8>}, {pipeline_mode = #tpu.pipeline_mode<synchronous>, transform_indices = @transform_11, window_bounds = array<i64: 8, 1>}, {pipeline_mode = #tpu.pipeline_mode<synchronous>, transform_indices = @transform_12, window_bounds = array<i64: 1, 1>}, {pipeline_mode = #tpu.pipeline_mode<synchronous>, transform_indices = @transform_13, window_bounds = array<i64: 2, 1>}]} {
    %c0 = arith.constant 0 : index
    %c0_0 = arith.constant 0 : index
    %0 = vector.load %arg1[%c0, %c0_0] : memref<12x16xf32, #tpu.memory_space<vmem>>, vector<12x16xf32>
    %c0_1 = arith.constant 0 : index
    %c0_2 = arith.constant 0 : index
    %1 = vector.load %arg2[%c0_1, %c0_2] : memref<12x2xf32, #tpu.memory_space<vmem>>, vector<12x2xf32>
    %c0_3 = arith.constant 0 : index
    %c0_4 = arith.constant 0 : index
    %2 = vector.load %arg5[%c0_3, %c0_4] : memref<16x1xf32, #tpu.memory_space<vmem>>, vector<16x1xf32>
    %cst = arith.constant dense<0.000000e+00> : vector<12x1xf32>
    %3 = tpu.matmul %0, %2, %cst {dimension_numbers = #tpu.dot_dimension_numbers<[1], [0], [0], [1], [0, 0, 1, 1], [], []>} : vector<12x16xf32>, vector<16x1xf32>, vector<12x1xf32> -> vector<12x1xf32>
    %c0_5 = arith.constant 0 : index
    %c0_6 = arith.constant 0 : index
    %4 = vector.load %arg6[%c0_5, %c0_6] : memref<1x1xf32, #tpu.memory_space<vmem>>, vector<1x1xf32>
    %5 = vector.broadcast %4 : vector<1x1xf32> to vector<12x1xf32>
    %6 = arith.addf %3, %5 : vector<12x1xf32>
    %cst_7 = arith.constant 0.000000e+00 : f32
    %7 = vector.broadcast %cst_7 : f32 to vector<12x2xf32>
    %8 = arith.cmpf ogt, %1, %7 : vector<12x2xf32>
    %cst_8 = arith.constant -1.000000e+09 : f32
    %9 = vector.shape_cast %6 : vector<12x1xf32> to vector<12x1xf32>
    %10 = vector.broadcast %9 : vector<12x1xf32> to vector<12x2xf32>
    %11 = vector.broadcast %cst_8 : f32 to vector<12x2xf32>
    %12 = arith.select %8, %10, %11 : vector<12x2xi1>, vector<12x2xf32>
    %cst_9 = arith.constant dense<0xFF800000> : vector<2xf32>
    %13 = vector.multi_reduction <maximumf>, %12, %cst_9 [0] : vector<12x2xf32> to vector<2xf32>
    %14 = vector.shape_cast %13 : vector<2xf32> to vector<1x2xf32>
    %15 = vector.broadcast %14 : vector<1x2xf32> to vector<12x2xf32>
    %16 = arith.subf %12, %15 : vector<12x2xf32>
    %17 = math.exp %16 : vector<12x2xf32>
    %18 = arith.mulf %17, %1 : vector<12x2xf32>
    %cst_10 = arith.constant dense<0.000000e+00> : vector<2xf32>
    %19 = vector.multi_reduction <add>, %18, %cst_10 [0] : vector<12x2xf32> to vector<2xf32>
    %20 = vector.shape_cast %19 : vector<2xf32> to vector<1x2xf32>
    %cst_11 = arith.constant 1.000000e-16 : f32
    %21 = vector.broadcast %cst_11 : f32 to vector<1x2xf32>
    %22 = arith.maximumf %20, %21 : vector<1x2xf32>
    %23 = vector.broadcast %22 : vector<1x2xf32> to vector<12x2xf32>
    %24 = arith.divf %18, %23 : vector<12x2xf32>
    %cst_12 = arith.constant dense<0.000000e+00> : vector<12xf32>
    %25 = vector.multi_reduction <add>, %24, %cst_12 [1] : vector<12x2xf32> to vector<12xf32>
    %26 = vector.shape_cast %25 : vector<12xf32> to vector<12x1xf32>
    %c0_13 = arith.constant 0 : index
    %c0_14 = arith.constant 0 : index
    %27 = vector.load %arg3[%c0_13, %c0_14] : memref<2x12xf32, #tpu.memory_space<vmem>>, vector<2x12xf32>
    %28 = vector.broadcast %26 : vector<12x1xf32> to vector<12x16xf32>
    %29 = arith.mulf %28, %0 : vector<12x16xf32>
    %cst_15 = arith.constant dense<0.000000e+00> : vector<2x16xf32>
    %30 = tpu.matmul %27, %29, %cst_15 {dimension_numbers = #tpu.dot_dimension_numbers<[1], [0], [0], [1], [0, 0, 1, 1], [], []>} : vector<2x12xf32>, vector<12x16xf32>, vector<2x16xf32> -> vector<2x16xf32>
    %c0_16 = arith.constant 0 : index
    %c0_17 = arith.constant 0 : index
    %31 = vector.load %arg7[%c0_16, %c0_17] : memref<16x32xf32, #tpu.memory_space<vmem>>, vector<16x32xf32>
    %cst_18 = arith.constant dense<0.000000e+00> : vector<2x32xf32>
    %32 = tpu.matmul %30, %31, %cst_18 {dimension_numbers = #tpu.dot_dimension_numbers<[1], [0], [0], [1], [0, 0, 1, 1], [], []>} : vector<2x16xf32>, vector<16x32xf32>, vector<2x32xf32> -> vector<2x32xf32>
    %c0_19 = arith.constant 0 : index
    %c0_20 = arith.constant 0 : index
    %33 = vector.load %arg4[%c0_19, %c0_20] : memref<2x2xf32, #tpu.memory_space<vmem>>, vector<2x2xf32>
    %c0_21 = arith.constant 0 : index
    %c0_22 = arith.constant 0 : index
    %34 = vector.load %arg8[%c0_21, %c0_22] : memref<2x32xf32, #tpu.memory_space<vmem>>, vector<2x32xf32>
    %cst_23 = arith.constant dense<0.000000e+00> : vector<2x32xf32>
    %35 = tpu.matmul %33, %34, %cst_23 {dimension_numbers = #tpu.dot_dimension_numbers<[1], [0], [0], [1], [0, 0, 1, 1], [], []>} : vector<2x2xf32>, vector<2x32xf32>, vector<2x32xf32> -> vector<2x32xf32>
    %36 = arith.addf %32, %35 : vector<2x32xf32>
    %c0_24 = arith.constant 0 : index
    %c0_25 = arith.constant 0 : index
    %37 = vector.load %arg9[%c0_24, %c0_25] : memref<1x32xf32, #tpu.memory_space<vmem>>, vector<1x32xf32>
    %38 = vector.broadcast %37 : vector<1x32xf32> to vector<2x32xf32>
    %39 = arith.addf %36, %38 : vector<2x32xf32>
    %cst_26 = arith.constant 0.000000e+00 : f32
    %40 = vector.broadcast %cst_26 : f32 to vector<2x32xf32>
    %41 = arith.maximumf %39, %40 : vector<2x32xf32>
    %c0_27 = arith.constant 0 : index
    %c0_28 = arith.constant 0 : index
    %42 = vector.load %arg10[%c0_27, %c0_28] : memref<32x8xf32, #tpu.memory_space<vmem>>, vector<32x8xf32>
    %c0_29 = arith.constant 0 : index
    %c0_30 = arith.constant 0 : index
    %43 = vector.load %arg11[%c0_29, %c0_30] : memref<1x8xf32, #tpu.memory_space<vmem>>, vector<1x8xf32>
    %cst_31 = arith.constant dense<0.000000e+00> : vector<2x8xf32>
    %44 = tpu.matmul %41, %42, %cst_31 {dimension_numbers = #tpu.dot_dimension_numbers<[1], [0], [0], [1], [0, 0, 1, 1], [], []>} : vector<2x32xf32>, vector<32x8xf32>, vector<2x8xf32> -> vector<2x8xf32>
    %45 = vector.broadcast %43 : vector<1x8xf32> to vector<2x8xf32>
    %46 = arith.addf %44, %45 : vector<2x8xf32>
    %cst_32 = arith.constant 0.000000e+00 : f32
    %47 = vector.broadcast %cst_32 : f32 to vector<2x8xf32>
    %48 = arith.maximumf %46, %47 : vector<2x8xf32>
    %c0_33 = arith.constant 0 : index
    %c0_34 = arith.constant 0 : index
    %49 = vector.load %arg12[%c0_33, %c0_34] : memref<8x1xf32, #tpu.memory_space<vmem>>, vector<8x1xf32>
    %c0_35 = arith.constant 0 : index
    %c0_36 = arith.constant 0 : index
    %50 = vector.load %arg13[%c0_35, %c0_36] : memref<1x1xf32, #tpu.memory_space<vmem>>, vector<1x1xf32>
    %cst_37 = arith.constant dense<0.000000e+00> : vector<2x1xf32>
    %51 = tpu.matmul %48, %49, %cst_37 {dimension_numbers = #tpu.dot_dimension_numbers<[1], [0], [0], [1], [0, 0, 1, 1], [], []>} : vector<2x8xf32>, vector<8x1xf32>, vector<2x1xf32> -> vector<2x1xf32>
    %52 = vector.broadcast %50 : vector<1x1xf32> to vector<2x1xf32>
    %53 = arith.addf %51, %52 : vector<2x1xf32>
    %c0_38 = arith.constant 0 : index
    %c0_39 = arith.constant 0 : index
    %54 = vector.load %arg14[%c0_38, %c0_39] : memref<2x1xf32, #tpu.memory_space<vmem>>, vector<2x1xf32>
    tpu.vector_store %arg14[%c0_38, %c0_39], %53 {strides = array<i32>} : memref<2x1xf32, #tpu.memory_space<vmem>>, vector<2x1xf32>,
    return
  }
  func.func @transform_0(%arg0: i32) -> (i32, i32) {
    %c0_i32 = arith.constant 0 : i32
    %c0_i32_0 = arith.constant 0 : i32
    %c0_i32_1 = arith.constant 0 : i32
    return %c0_i32, %c0_i32_0 : i32, i32
  }
  func.func @transform_1(%arg0: i32) -> (i32, i32) {
    %c0_i32 = arith.constant 0 : i32
    %c0_i32_0 = arith.constant 0 : i32
    %c0_i32_1 = arith.constant 0 : i32
    return %c0_i32, %c0_i32_0 : i32, i32
  }
  func.func @transform_2(%arg0: i32) -> (i32, i32) {
    %c0_i32 = arith.constant 0 : i32
    %c0_i32_0 = arith.constant 0 : i32
    %c0_i32_1 = arith.constant 0 : i32
    return %c0_i32, %c0_i32_0 : i32, i32
  }
  func.func @transform_3(%arg0: i32) -> (i32, i32) {
    %c0_i32 = arith.constant 0 : i32
    %c0_i32_0 = arith.constant 0 : i32
    %c0_i32_1 = arith.constant 0 : i32
    return %c0_i32, %c0_i32_0 : i32, i32
  }
  func.func @transform_4(%arg0: i32) -> (i32, i32) {
    %c0_i32 = arith.constant 0 : i32
    %c0_i32_0 = arith.constant 0 : i32
    %c0_i32_1 = arith.constant 0 : i32
    return %c0_i32, %c0_i32_0 : i32, i32
  }
  func.func @transform_5(%arg0: i32) -> (i32, i32) {
    %c0_i32 = arith.constant 0 : i32
    %c0_i32_0 = arith.constant 0 : i32
    %c0_i32_1 = arith.constant 0 : i32
    return %c0_i32, %c0_i32_0 : i32, i32
  }
  func.func @transform_6(%arg0: i32) -> (i32, i32) {
    %c0_i32 = arith.constant 0 : i32
    %c0_i32_0 = arith.constant 0 : i32
    %c0_i32_1 = arith.constant 0 : i32
    return %c0_i32, %c0_i32_0 : i32, i32
  }
  func.func @transform_7(%arg0: i32) -> (i32, i32) {
    %c0_i32 = arith.constant 0 : i32
    %c0_i32_0 = arith.constant 0 : i32
    %c0_i32_1 = arith.constant 0 : i32
    return %c0_i32, %c0_i32_0 : i32, i32
  }
  func.func @transform_8(%arg0: i32) -> (i32, i32) {
    %c0_i32 = arith.constant 0 : i32
    %c0_i32_0 = arith.constant 0 : i32
    %c0_i32_1 = arith.constant 0 : i32
    return %c0_i32, %c0_i32_0 : i32, i32
  }
  func.func @transform_9(%arg0: i32) -> (i32, i32) {
    %c0_i32 = arith.constant 0 : i32
    %c0_i32_0 = arith.constant 0 : i32
    %c0_i32_1 = arith.constant 0 : i32
    return %c0_i32, %c0_i32_0 : i32, i32
  }
  func.func @transform_10(%arg0: i32) -> (i32, i32) {
    %c0_i32 = arith.constant 0 : i32
    %c0_i32_0 = arith.constant 0 : i32
    %c0_i32_1 = arith.constant 0 : i32
    return %c0_i32, %c0_i32_0 : i32, i32
  }
  func.func @transform_11(%arg0: i32) -> (i32, i32) {
    %c0_i32 = arith.constant 0 : i32
    %c0_i32_0 = arith.constant 0 : i32
    %c0_i32_1 = arith.constant 0 : i32
    return %c0_i32, %c0_i32_0 : i32, i32
  }
  func.func @transform_12(%arg0: i32) -> (i32, i32) {
    %c0_i32 = arith.constant 0 : i32
    %c0_i32_0 = arith.constant 0 : i32
    %c0_i32_1 = arith.constant 0 : i32
    return %c0_i32, %c0_i32_0 : i32, i32
  }
  func.func @transform_13(%arg0: i32) -> (i32, i32) {
    %c0_i32 = arith.constant 0 : i32
    %c0_i32_0 = arith.constant 0 : i32
    %c0_i32_1 = arith.constant 0 : i32
    return %c0_i32, %c0_i32_0 : i32, i32
  }
}

</mosaic_0001>

<bundles_post_ra>
// kernel: gnn_forward.4
= control target key start
LH: loop header
LB: loop body
LE: loop exit
PB: predicated region body
PF: predicated region fallthrough
CT: control target
= control target key end

     0   :  { %vm71_vm0 = vcmask 130048   ;;  %v1389_v5 = vmov 0.0|0.0   ;;  %vm159_vm1 = vcmask 31744   ;;  %vm175_vm2 = vcmask 1043456   ;;  %s1782_s5 = inlined_call_operand.vmem [shape: f32[16,64], index: 5, kind: input, shape index: {}]   ;;  %s1783_s0 = inlined_call_operand.vmem [shape: f32[12,16], index: 0, kind: input, shape index: {}]   ;;  %s1784_s7 = inlined_call_operand.vmem [shape: f32[4,32], index: 7, kind: input, shape index: {}]   ;;  %s1785_s1 = inlined_call_operand.vmem [shape: f32[36,4], index: 1, kind: input, shape index: {}]   ;;  %s1786_s6 = inlined_call_operand.vmem [shape: f32[1,64], index: 6, kind: input, shape index: {}]   ;;  %s1787_s2 = inlined_call_operand.vmem [shape: f32[36,12], index: 2, kind: input, shape index: {}]   ;;  %s1788_s8 = inlined_call_operand.vmem [shape: f32[32,2], index: 8, kind: input, shape index: {}]   ;;  %s1789_s3 = inlined_call_operand.vmem [shape: f32[36,12], index: 3, kind: input, shape index: {}]   ;;  %s1790_s4 = inlined_call_operand.vmem [shape: f32[12,36], index: 4, kind: input, shape index: {}]   ;;  %s1791_s11 = inlined_call_operand.vmem [shape: f32[32,16], index: 11, kind: input, shape index: {}]   ;;  %s1792_s9 = inlined_call_operand.vmem [shape: f32[2,32], index: 9, kind: input, shape index: {}]   ;;  %s1793_s10 = inlined_call_operand.vmem [shape: f32[1,32], index: 10, kind: input, shape index: {}]   ;;  %s1794_s12 = inlined_call_operand.vmem [shape: f32[1,16], index: 12, kind: input, shape index: {}]   ;;  %s1795_s13 = inlined_call_operand.vmem [shape: f32[1,16], index: 13, kind: input, shape index: {}]   ;;  %s1796_s14 = inlined_call_operand.vmem [shape: f32[1,16], index: 14, kind: input, shape index: {}]   ;;  %s1797_s15 = inlined_call_operand.vmem [shape: f32[12,16], index: 15, kind: output, shape index: {}]  }
   0x1   :  { %v62_v0 = vld [vmem:[%s1782_s5] sm:$0xff]  ;;  %v63_v1 = vld [vmem:[%s1782_s5 + $0x8] sm:$0xff]  ;;  %v1390_v6 = vmov 0.0   ;;  %vm1391_vm3 = vmmov 0   ;;  %v155_v10 = vld [vmem:[%s1785_s1 + $0x10] sm:$0xff]  ;;  %vm1392_vm4 = vmmov 1  }
   0x2   :  { %v50_v2 = vld [vmem:[%s1783_s0] sm:$0xff]  ;;  %v1297_v3 = vpack.c.bf16 %v63_v1, %v62_v0  ;;  %v51_v4 = vld [vmem:[%s1783_s0 + $0x8] sm:$0xf]  ;;  %1195 = vmatprep.subr.mxu1 %v1390_v6  ;;  %1197 = vmatprep.mubr.msk.f32.mxu1 %vm1391_vm3, %v1390_v6  ;;  %v156_v11 = vld [vmem:[%s1785_s1 + $0x18] sm:$0xff]  ;;  %vm269_vm6 = vcmask 97280   ;;  %v1394_v49 = vmov 1  }
   0x3   :  { %1192 = vmatprep.mubr.msk.f32.mxu0 %vm71_vm0, %v50_v2  ;;  %v158_v7 = vld [vmem:[%s1784_s7] sm:$0xf]  ;;  %v154_v9 = vld [vmem:[%s1785_s1 + $0x8] sm:$0xff]  ;;  %vm1533_vm5 = vmpackc.low %vm175_vm2, %vm1392_vm4  ;;  %1359 = vset.pattern.permute.xlu1 %v1394_v49  ;;  %v1395_v50 = vmov 0   ;;  %vm520_vm8 = vcmask 261120   ;;  %vm666_vm4 = vcmask 93184  }
   0x4   :  { %1298 = vmatprep.subr.bf16.mxu0 %v1297_v3  ;;  %v153_v8 = vld [vmem:[%s1785_s1] sm:$0xff]  ;;  %1196 = vmatpush3.msk.msra.mxu1 %vm175_vm2, %v158_v7  ;;  %v53_v22 = vld [vmem:[%s1787_s2 + $0x8] sm:$0xff]  ;;  %v54_v23 = vld [vmem:[%s1787_s2 + $0x10] sm:$0xff] }
   0x5   :  { %1300 = vmatpush3.bf16.msra.mxu0 %v1297_v3  ;;  %1198 = vmatmul.mubr.msk.f32.vlgmr.msra.gmra.mrb[0].mxu1 %vm159_vm1, %v153_v8  ;;  %v157_v12 = vld [vmem:[%s1785_s1 + $0x20] sm:$0xf]  ;;  %s1393_s1 = smov 96   ;;  %v517_v25 = vld [vmem:[%s1788_s8 + $0x8] sm:$0xff]  ;;  %v55_v26 = vld [vmem:[%s1787_s2 + $0x18] sm:$0xff] }
   0x6   :  { %1301 = vmatprep.subr.bf16.mxu0 %v1389_v5  ;;  %1305 = vmatprep.subr.bf16.mxu1 %v1389_v5  ;;  %v1107_v13 = vld [vmem:[%s1786_s6] ss:$0 sm:$0xff]  ;;  %v1589_v34 = vld [vmem:[%s1789_s3 + $0x8] sm:$0xff]  ;;  %v1598_v35 = vld [vmem:[%s1789_s3 + $0x10] sm:$0xff] }
   0x7   :  { %1200 = vmatprep.mubr.msk.f32.mxu1 %vm1391_vm3, %v1390_v6  ;;  %v52_v21 = vld [vmem:[%s1787_s2] sm:$0xff]  ;;  %v1607_v36 = vld [vmem:[%s1789_s3 + $0x18] sm:$0xff]  ;;  %v518_v38 = vld [vmem:[%s1788_s8 + $0x10] sm:$0xff]  ;;  %1358 = vset.pattern.permute.xlu0 %v1395_v50  ;;  %vm628_vm15 = vcmp.gt.f32.partialorder %v1589_v34, 0.0 }
   0x8   :  { %1193 = vmatmul.mubr.msk.f32.vlgmr.msra.gmra.mrb[0].mxu0 %vm71_vm0, %v51_v4  ;;  %v516_v24 = vld [vmem:[%s1788_s8] sm:$0xff]  ;;  %v519_v39 = vld [vmem:[%s1788_s8 + $0x18] sm:$0xff]  ;;  %vm630_vm14 = vcmp.gt.f32.partialorder %v1607_v36, 0.0 }
   0x9   :  { %1216 = vmatprep.mubr.msk.f32.mxu0 %vm1391_vm3, %v1390_v6  ;;  %1201 = vmatmul.mubr.msk.f32.gmra.mrb[2].mxu1 %vm159_vm1, %v154_v9  ;;  %v1310_v27 = vpack.c.bf16 %v517_v25, %v516_v24  ;;  %v56_v28 = vld [vmem:[%s1787_s2 + $0x20] sm:$0xf]  ;;  %v1313_v40 = vpack.c.bf16 %v519_v39, %v518_v38 }
   0xa   :  { %1203 = vmatprep.mubr.msk.f32.mxu1 %vm1391_vm3, %v1390_v6  ;;  %v1580_v33 = vld [vmem:[%s1789_s3] sm:$0xff] }
   0xb   :  { %v1616_v37 = vld [vmem:[%s1789_s3 + $0x20] sm:$0xf]  ;;  %vm627_vm13 = vcmp.gt.f32.partialorder %v1580_v33, 0.0 }
   0xd   :  { %1204 = vmatmul.mubr.msk.f32.gmra.mrb[4].mxu1 %vm159_vm1, %v155_v10 }
   0xe   :  { %1206 = vmatprep.mubr.msk.f32.mxu1 %vm1391_vm3, %v1390_v6 }
  0x11   :  { %1207 = vmatmul.mubr.msk.f32.gmra.mrb[6].mxu1 %vm159_vm1, %v156_v11 }
  0x12   :  { %1209 = vmatprep.mubr.msk.f32.mxu1 %vm1391_vm3, %v1390_v6 }
  0x15   :  { %1210 = vmatmul.mubr.msk.f32.gmra.mrb[8].mxu1 %vm159_vm1, %v157_v12  ;;  %vm629_vm1 = vcmp.gt.f32.partialorder %v1598_v35, 0.0 }
  0x16   :  { %1235 = vmatprep.mubr.msk.f32.mxu1 %vm1391_vm3, %v1390_v6 }
  0xdb   :  { %v1194_v14 = vpop.f32.mrb[0].mxu0 }
  0xdc   :  { %v150_v15 = vadd.f32 %v1194_v14, %v1107_v13  ;;  %v144_v16 = vpop.f32.mrb[1].mxu0 }
  0xdd   :  { %v145_v17 = vadd.f32 %v1107_v13, %v144_v16 }
  0xdf   :  { %v1302_v19 = vpack.c.bf16 %v150_v15, %v145_v17  ;;  %v1353_v20 = vpack.i.bf16 %v150_v15, %v145_v17 }
  0xe1   :  { %1354 = vrot.lane.b32.xlu0 %v1353_v20, %s1393_s1  ;;  %1304 = vmatpush3.bf16.msk.msra.mxu0 %vm1533_vm5, %v1302_v19 }
  0xe2   :  { %1309 = vmatprep.subr.bf16.mxu0 %v1389_v5 }
  0xe4   :  { %1217 = vmatmul.mubr.msk.f32.vlgmr.msra.gmra.mrb[2].mxu0 %vm269_vm6, %v52_v21 }
  0xe5   :  { %1219 = vmatprep.mubr.msk.f32.mxu0 %vm1391_vm3, %v1390_v6  ;;  %1311 = vmatpush3.bf16.msra.mxu0 %v1310_v27 }
  0xe6   :  { %1312 = vmatprep.subr.bf16.mxu0 %v1389_v5 }
  0xe8   :  { %1220 = vmatmul.mubr.msk.f32.gmra.mrb[4].mxu0 %vm269_vm6, %v53_v22 }
  0xe9   :  { %1222 = vmatprep.mubr.msk.f32.mxu0 %vm1391_vm3, %v1390_v6  ;;  %1314 = vmatpush3.bf16.msra.mxu0 %v1313_v40 }
  0xec   :  { %1223 = vmatmul.mubr.msk.f32.gmra.mrb[6].mxu0 %vm269_vm6, %v54_v23 }
  0xed   :  { %1225 = vmatprep.mubr.msk.f32.mxu0 %vm1391_vm3, %v1390_v6 }
  0xf0   :  { %1226 = vmatmul.mubr.msk.f32.gmra.mrb[8].mxu0 %vm269_vm6, %v55_v26 }
  0xf1   :  { %1228 = vmatprep.mubr.msk.f32.mxu0 %vm1391_vm3, %v1390_v6 }
  0xf4   :  { %1229 = vmatmul.mubr.msk.f32.gmra.mrb[10].mxu0 %vm269_vm6, %v56_v28 }
  0xf5   :  { %1258 = vmatprep.mubr.msk.f32.mxu0 %vm1391_vm3, %v1390_v6 }
 0x153   :  { %v1355_v29 = vpop.permute.xlu0 %1354 }
 0x154   :  { %v1357_v30 = vunpack.i.h.bf16 %v1355_v29  ;;  %v1356_v31 = vunpack.i.l.bf16 %v1355_v29 }
 0x156   :  { %v1306_v32 = vpack.c.bf16 %v1357_v30, %v1356_v31 }
 0x158   :  { %1308 = vmatpush3.bf16.msk.msra.mxu1 %vm1533_vm5, %v1306_v32  ;;  %vm874_vm5 = vcmask 293888  }
 0x15b   :  { %1236 = vmatmul.mubr.msk.f32.vlgmr.msra.gmra.mrb[0].mxu1 %vm269_vm6, %v1580_v33 }
 0x15c   :  { %1238 = vmatprep.mubr.msk.f32.mxu1 %vm1391_vm3, %v1390_v6 }
 0x15f   :  { %1239 = vmatmul.mubr.msk.f32.gmra.mrb[2].mxu1 %vm269_vm6, %v1589_v34 }
 0x160   :  { %1241 = vmatprep.mubr.msk.f32.mxu1 %vm1391_vm3, %v1390_v6 }
 0x163   :  { %1242 = vmatmul.mubr.msk.f32.gmra.mrb[4].mxu1 %vm269_vm6, %v1598_v35 }
 0x164   :  { %1244 = vmatprep.mubr.msk.f32.mxu1 %vm1391_vm3, %v1390_v6 }
 0x167   :  { %1245 = vmatmul.mubr.msk.f32.gmra.mrb[6].mxu1 %vm269_vm6, %v1607_v36 }
 0x168   :  { %1247 = vmatprep.mubr.msk.f32.mxu1 %vm1391_vm3, %v1390_v6 }
 0x16b   :  { %1248 = vmatmul.mubr.msk.f32.gmra.mrb[8].mxu1 %vm269_vm6, %v1616_v37 }
 0x1b7   :  { %v1626_v41 = vpop.f32.mrb[2].mxu0 }
 0x1b8   :  { %v1218_v42 = vpop.f32.mrb[3].mxu0 }
 0x1bb   :  { %v1628_v43 = vpop.f32.mrb[4].mxu0 }
 0x1bc   :  { %v1221_v44 = vpop.f32.mrb[5].mxu0 }
 0x1bf   :  { %v1630_v45 = vpop.f32.mrb[6].mxu0 }
 0x1c0   :  { %v1224_v46 = vpop.f32.mrb[7].mxu0 }
 0x1c3   :  { %v1632_v47 = vpop.f32.mrb[8].mxu0 }
 0x1c4   :  { %v1227_v48 = vpop.f32.mrb[9].mxu0 }
 0x1c7   :  { %v1635_v51 = vpop.f32.mrb[10].mxu0 }
 0x1c8   :  { %v1230_v52 = vpop.f32.mrb[11].mxu0 }
 0x22e   :  { %v467_v53 = vpop.f32.mrb[0].mxu1 }
 0x22f   :  { %v491_v54 = vadd.f32 %v467_v53, %v1626_v41  ;;  %v1237_v55 = vpop.f32.mrb[1].mxu1 }
 0x231   :  { %vm501_vm7 = vcmp.gt.f32.partialorder %v491_v54, 0.0  ;;  %v506_v56 = vmul.f32 0.2, %v491_v54 }
 0x232   :  { %v472_v57 = vpop.f32.mrb[2].mxu1 }
 0x233   :  { %v511_v58 = vsel %vm501_vm7, %v491_v54, %v506_v56  ;;  %v492_v59 = vadd.f32 %v472_v57, %v1628_v43  ;;  %v1240_v60 = vpop.f32.mrb[3].mxu1 }
 0x234   :  { %1259 = vmatmul.mubr.msk.f32.vlgmr.msra.gmra.mrb[12].mxu0 %vm520_vm8, %v511_v58 }
 0x235   :  { %vm502_vm9 = vcmp.gt.f32.partialorder %v492_v59, 0.0  ;;  %v507_v61 = vmul.f32 0.2, %v492_v59  ;;  %1261 = vmatprep.mubr.msk.f32.mxu0 %vm1391_vm3, %v1390_v6 }
 0x236   :  { %v477_v62 = vpop.f32.mrb[4].mxu1 }
 0x237   :  { %v493_v63 = vadd.f32 %v477_v62, %v1630_v45  ;;  %v1243_v0 = vpop.f32.mrb[5].mxu1  ;;  %v512_v1 = vsel %vm502_vm9, %v492_v59, %v507_v61 }
 0x238   :  { %1262 = vmatmul.mubr.msk.f32.gmra.mrb[14].mxu0 %vm520_vm8, %v512_v1 }
 0x239   :  { %vm503_vm10 = vcmp.gt.f32.partialorder %v493_v63, 0.0  ;;  %v508_v2 = vmul.f32 0.2, %v493_v63  ;;  %1264 = vmatprep.mubr.msk.f32.mxu0 %vm1391_vm3, %v1390_v6 }
 0x23a   :  { %v482_v3 = vpop.f32.mrb[6].mxu1 }
 0x23b   :  { %v494_v4 = vadd.f32 %v482_v3, %v1632_v47  ;;  %v1246_v5 = vpop.f32.mrb[7].mxu1  ;;  %v513_v7 = vsel %vm503_vm10, %v493_v63, %v508_v2 }
 0x23c   :  { %1265 = vmatmul.mubr.msk.f32.gmra.mrb[16].mxu0 %vm520_vm8, %v513_v7 }
 0x23d   :  { %vm504_vm11 = vcmp.gt.f32.partialorder %v494_v4, 0.0  ;;  %v509_v8 = vmul.f32 0.2, %v494_v4  ;;  %1267 = vmatprep.mubr.msk.f32.mxu0 %vm1391_vm3, %v1390_v6 }
 0x23e   :  { %v487_v9 = vpop.f32.mrb[8].mxu1 }
 0x23f   :  { %v495_v10 = vadd.f32 %v487_v9, %v1635_v51  ;;  %v1249_v11 = vpop.f32.mrb[9].mxu1  ;;  %v514_v12 = vsel %vm504_vm11, %v494_v4, %v509_v8 }
 0x240   :  { %1268 = vmatmul.mubr.msk.f32.gmra.mrb[18].mxu0 %vm520_vm8, %v514_v12 }
 0x241   :  { %vm505_vm12 = vcmp.gt.f32.partialorder %v495_v10, 0.0  ;;  %v510_v13 = vmul.f32 0.2, %v495_v10  ;;  %1270 = vmatprep.mubr.msk.f32.mxu0 %vm1391_vm3, %v1390_v6  ;;  %vm631_vm3 = vcmp.gt.f32.partialorder %v1616_v37, 0.0 }
 0x243   :  { %v515_v14 = vsel %vm505_vm12, %v495_v10, %v510_v13 }
 0x244   :  { %1271 = vmatmul.mubr.msk.f32.gmra.mrb[20].mxu0 %vm520_vm8, %v515_v14 }
 0x307   :  { %v602_v15 = vpop.f32.mrb[12].mxu0 }
 0x308   :  { %750 = vperm.xlu1 %1359, %v602_v15   ;;  %634 = vperm.xlu0 %1358, %v602_v15   ;;  %v1260_v16 = vpop.f32.mrb[13].mxu0 }
 0x30b   :  { %v607_v17 = vpop.f32.mrb[14].mxu0 }
 0x30c   :  { %754 = vperm.xlu1 %1359, %v607_v17   ;;  %639 = vperm.xlu0 %1358, %v607_v17   ;;  %v1263_v18 = vpop.f32.mrb[15].mxu0 }
 0x30f   :  { %v612_v19 = vpop.f32.mrb[16].mxu0 }
 0x310   :  { %1360 = vset.pattern.permute.xlu1 %v1395_v50  ;;  %v1266_v20 = vpop.f32.mrb[17].mxu0 }
 0x311   :  { %644 = vperm.xlu1 %1360, %v612_v19  }
 0x313   :  { %v617_v21 = vpop.f32.mrb[18].mxu0 }
 0x314   :  { %649 = vperm.xlu0 %1358, %v617_v21   ;;  %v1269_v22 = vpop.f32.mrb[19].mxu0 }
 0x317   :  { %v622_v23 = vpop.f32.mrb[20].mxu0 }
 0x318   :  { %1361 = vset.pattern.permute.xlu0 %v1394_v49  ;;  %654 = vperm.xlu1 %1360, %v622_v23   ;;  %v1272_v6 = vpop.f32.mrb[21].mxu0 }
 0x319   :  { %758 = vperm.xlu0 %1361, %v612_v19  }
 0x31c   :  { %1362 = vset.pattern.permute.xlu1 %v1394_v49 }
 0x31d   :  { %766 = vperm.xlu1 %1362, %v622_v23  }
 0x321   :  { %762 = vperm.xlu1 %1362, %v617_v21  }
 0x387   :  { %v751_v24 = vpop.permute.xlu1 %750  ;;  %v635_v25 = vpop.permute.xlu0 %634 }
 0x388   :  { %v657_v30 = vsel %vm627_vm13, %v635_v25, -1e+09  ;;  %v769_v49 = vsel %vm627_vm13, %v751_v24, -1e+09 }
 0x389   :  { %v662_v42 = vsel %vm269_vm6, %v657_v30, -inf  ;;  %v774_v58 = vsel %vm269_vm6, %v769_v49, -inf }
 0x38b   :  { %v755_v26 = vpop.permute.xlu1 %754  ;;  %v640_v27 = vpop.permute.xlu0 %639 }
 0x38c   :  { %v658_v38 = vsel %vm628_vm15, %v640_v27, -1e+09  ;;  %v770_v61 = vsel %vm628_vm15, %v755_v26, -1e+09 }
 0x38d   :  { %v663_v50 = vsel %vm269_vm6, %v658_v38, -inf  ;;  %v775_v3 = vsel %vm269_vm6, %v770_v61, -inf }
 0x390   :  { %v645_v28 = vpop.permute.xlu1 %644 }
 0x391   :  { %v659_v39 = vsel %vm629_vm1, %v645_v28, -1e+09 }
 0x392   :  { %v664_v52 = vsel %vm269_vm6, %v659_v39, -inf }
 0x393   :  { %v650_v29 = vpop.permute.xlu0 %649 }
 0x394   :  { %v660_v31 = vsel %vm630_vm14, %v650_v29, -1e+09 }
 0x395   :  { %v665_v44 = vsel %vm269_vm6, %v660_v31, -inf }
 0x396   :  { %v670_v53 = vmax.f32 %v664_v52, %v665_v44 }
 0x397   :  { %v655_v32 = vpop.permute.xlu1 %654 }
 0x398   :  { %v661_v40 = vsel %vm631_vm3, %v655_v32, -1e+09  ;;  %v759_v55 = vpop.permute.xlu0 %758 }
 0x399   :  { %v667_v46 = vsel %vm666_vm4, %v661_v40, -inf  ;;  %v771_v62 = vsel %vm629_vm1, %v759_v55, -1e+09 }
 0x39a   :  { %v668_v48 = vmax.f32 %v662_v42, %v667_v46  ;;  %v776_v5 = vsel %vm269_vm6, %v771_v62, -inf }
 0x39c   :  { %v669_v54 = vmax.f32 %v668_v48, %v663_v50  ;;  %v767_v56 = vpop.permute.xlu1 %766 }
 0x39d   :  { %v773_v57 = vsel %vm631_vm3, %v767_v56, -1e+09 }
 0x39e   :  { %v671_v59 = vmax.f32 %v669_v54, %v670_v53  ;;  %v778_v60 = vsel %vm666_vm4, %v773_v57, -inf }
 0x39f   :  { %v779_v63 = vmax.f32 %v774_v58, %v778_v60 }
 0x3a0   :  { %v672_v0 = vrot.slane %v671_v59, 4  ;;  %v763_v1 = vpop.permute.xlu1 %762 }
 0x3a1   :  { %v772_v2 = vsel %vm630_vm14, %v763_v1, -1e+09  ;;  %v780_v8 = vmax.f32 %v779_v63, %v775_v3 }
 0x3a2   :  { %v673_v4 = vmax.f32 %v671_v59, %v672_v0  ;;  %v777_v7 = vsel %vm269_vm6, %v772_v2, -inf }
 0x3a3   :  { %v781_v9 = vmax.f32 %v776_v5, %v777_v7 }
 0x3a4   :  { %v674_v10 = vrot.slane %v673_v4, 2 }
 0x3a5   :  { %v782_v11 = vmax.f32 %v780_v8, %v781_v9 }
 0x3a6   :  { %v675_v12 = vmax.f32 %v673_v4, %v674_v10 }
 0x3a7   :  { %v783_v13 = vrot.slane %v782_v11, 4 }
 0x3a8   :  { %v676_v14 = vrot.slane %v675_v12, 1 }
 0x3a9   :  { %v784_v15 = vmax.f32 %v782_v11, %v783_v13 }
 0x3aa   :  { %v677_v16 = vmax.f32 %v675_v12, %v676_v14 }
 0x3ab   :  { %v785_v17 = vrot.slane %v784_v15, 2 }
 0x3ac   :  { %v681_v18 = vsub.f32 %v660_v31, %v677_v16  ;;  %v682_v19 = vsub.f32 %v661_v40, %v677_v16  ;;  %v678_v20 = vsub.f32 %v657_v30, %v677_v16  ;;  %v679_v21 = vsub.f32 %v658_v38, %v677_v16 }
 0x3ad   :  { %v786_v22 = vmax.f32 %v784_v15, %v785_v17  ;;  %v680_v23 = vsub.f32 %v659_v39, %v677_v16 }
 0x3ae   :  { %v691_v6 = vmul.f32 1.442695, %v682_v19  ;;  %v683_v24 = vmul.f32 1.442695, %v678_v20  ;;  %v685_v26 = vmul.f32 1.442695, %v679_v21 }
 0x3af   :  { %v787_v25 = vrot.slane %v786_v22, 1  ;;  %v687_v27 = vmul.f32 1.442695, %v680_v23  ;;  %v689_v28 = vmul.f32 1.442695, %v681_v18 }
 0x3b0   :  { %1363 = vpow2.f32 %v691_v6 }
 0x3b1   :  { %v788_v29 = vmax.f32 %v786_v22, %v787_v25  ;;  %1365 = vpow2.f32 %v683_v24 }
 0x3b2   :  { %1367 = vpow2.f32 %v685_v26 }
 0x3b3   :  { %v791_v32 = vsub.f32 %v771_v62, %v788_v29  ;;  %v792_v42 = vsub.f32 %v772_v2, %v788_v29  ;;  %1369 = vpow2.f32 %v687_v27  ;;  %v793_v44 = vsub.f32 %v773_v57, %v788_v29 }
 0x3b4   :  { %1371 = vpow2.f32 %v689_v28  ;;  %v789_v31 = vsub.f32 %v769_v49, %v788_v29  ;;  %v790_v30 = vsub.f32 %v770_v61, %v788_v29 }
 0x3b5   :  { %v800_v38 = vmul.f32 1.442695, %v792_v42  ;;  %v798_v46 = vmul.f32 1.442695, %v791_v32  ;;  %v802_v48 = vmul.f32 1.442695, %v793_v44 }
 0x3b6   :  { %v794_v40 = vmul.f32 1.442695, %v789_v31  ;;  %v796_v39 = vmul.f32 1.442695, %v790_v30 }
 0x3b7   :  { %1373 = vpow2.f32 %v800_v38 }
 0x3b8   :  { %1375 = vpow2.f32 %v794_v40 }
 0x3b9   :  { %1377 = vpow2.f32 %v796_v39 }
 0x3ba   :  { %v1364_v50 = vpop.eup %1363  ;;  %1379 = vpow2.f32 %v798_v46 }
 0x3bb   :  { %v1366_v52 = vpop.eup %1365  ;;  %1381 = vpow2.f32 %v802_v48  ;;  %v1699_v62 = vmul.f32 %v1364_v50, %v1616_v37 }
 0x3bc   :  { %v1368_v53 = vpop.eup %1367  ;;  %v693_v54 = vmul.f32 %v1366_v52, %v1580_v33 }
 0x3bd   :  { %v1370_v55 = vpop.eup %1369  ;;  %v694_v56 = vmul.f32 %v1368_v53, %v1589_v34  ;;  %v705_v9 = vsel %vm666_vm4, %v1699_v62, 0.0 }
 0x3be   :  { %v1372_v49 = vpop.eup %1371  ;;  %v695_v57 = vmul.f32 %v1370_v55, %v1598_v35  ;;  %v698_v58 = vsel %vm269_vm6, %v693_v54, 0.0 }
 0x3bf   :  { %v696_v59 = vmul.f32 %v1372_v49, %v1607_v36  ;;  %v699_v60 = vsel %vm269_vm6, %v694_v56, 0.0 }
 0x3c0   :  { %v700_v61 = vadd.f32 %v699_v60, %v698_v58  ;;  %v701_v63 = vsel %vm269_vm6, %v695_v57, 0.0 }
 0x3c1   :  { %v1374_v0 = vpop.eup %1373  ;;  %v703_v3 = vsel %vm269_vm6, %v696_v59, 0.0 }
 0x3c2   :  { %v702_v1 = vadd.f32 %v701_v63, %v700_v61  ;;  %v1376_v2 = vpop.eup %1375  ;;  %v807_v15 = vmul.f32 %v1374_v0, %v1607_v36 }
 0x3c3   :  { %v1378_v4 = vpop.eup %1377  ;;  %v804_v7 = vmul.f32 %v1376_v2, %v1580_v33  ;;  %v860_v2 = vld [vmem:[%s1790_s4] sm:$0xff] }
 0x3c4   :  { %v704_v5 = vadd.f32 %v703_v3, %v702_v1  ;;  %v1380_v8 = vpop.eup %1379  ;;  %v805_v10 = vmul.f32 %v1378_v4, %v1589_v34  ;;  %v814_v34 = vsel %vm269_vm6, %v807_v15, 0.0  ;;  %1283 = vmatprep.mubr.msk.f32.mxu1 %vm874_vm5, %v860_v2  ;;  %v959_v3 = vld [vmem:[%s1791_s11] sm:$0xff] }
 0x3c5   :  { %v1382_v11 = vpop.eup %1381  ;;  %v806_v13 = vmul.f32 %v1380_v8, %v1598_v35  ;;  %v809_v14 = vsel %vm269_vm6, %v804_v7, 0.0 }
 0x3c6   :  { %v706_v12 = vadd.f32 %v705_v9, %v704_v5  ;;  %v810_v16 = vsel %vm269_vm6, %v805_v10, 0.0  ;;  %v808_v33 = vmul.f32 %v1382_v11, %v1616_v37  ;;  %v735_v5 = vlaneseq }
 0x3c7   :  { %v811_v18 = vadd.f32 %v810_v16, %v809_v14  ;;  %v812_v19 = vsel %vm269_vm6, %v806_v13, 0.0 }
 0x3c8   :  { %v707_v17 = vrot.slane %v706_v12, 4  ;;  %v816_v35 = vsel %vm666_vm4, %v808_v33, 0.0 }
 0x3c9   :  { %v813_v21 = vadd.f32 %v812_v19, %v811_v18 }
 0x3ca   :  { %v708_v20 = vadd.f32 %v707_v17, %v706_v12 }
 0x3cb   :  { %v815_v23 = vadd.f32 %v814_v34, %v813_v21 }
 0x3cc   :  { %v709_v22 = vrot.slane %v708_v20, 2 }
 0x3cd   :  { %v817_v24 = vadd.f32 %v816_v35, %v815_v23 }
 0x3ce   :  { %v710_v6 = vadd.f32 %v709_v22, %v708_v20 }
 0x3cf   :  { %v818_v36 = vrot.slane %v817_v24, 4 }
 0x3d0   :  { %v711_v25 = vrot.slane %v710_v6, 1 }
 0x3d1   :  { %v819_v27 = vadd.f32 %v818_v36, %v817_v24 }
 0x3d2   :  { %v712_v26 = vadd.f32 %v711_v25, %v710_v6 }
 0x3d3   :  { %v820_v29 = vrot.slane %v819_v27, 2 }
 0x3d4   :  { %v713_v28 = vmax.f32 %v712_v26, 1e-16 }
 0x3d5   :  { %v821_v37 = vadd.f32 %v820_v29, %v819_v27 }
 0x3d6   :  { %1383 = vrcp.f32 %v713_v28 }
 0x3d7   :  { %v822_v32 = vrot.slane %v821_v37, 1 }
 0x3d9   :  { %v823_v42 = vadd.f32 %v822_v32, %v821_v37 }
 0x3db   :  { %v824_v44 = vmax.f32 %v823_v42, 1e-16 }
 0x3dd   :  { %1385 = vrcp.f32 %v824_v44 }
 0x3e0   :  { %v1384_v31 = vpop.eup %1383 }
 0x3e1   :  { %v716_v30 = vmul.f32 %v1384_v31, %v694_v56  ;;  %v715_v38 = vmul.f32 %v1384_v31, %v693_v54  ;;  %v718_v55 = vmul.f32 %v1384_v31, %v696_v59  ;;  %v717_v49 = vmul.f32 %v1384_v31, %v695_v57 }
 0x3e2   :  { %v719_v1 = vmul.f32 %v1384_v31, %v1699_v62  ;;  %v960_v62 = vld [vmem:[%s1791_s11 + $0x8] sm:$0xff] }
 0x3e3   :  { %v723_v40 = vsel %vm269_vm6, %v716_v30, 0.0  ;;  %v720_v39 = vsel %vm269_vm6, %v715_v38, 0.0  ;;  %v729_v56 = vsel %vm269_vm6, %v718_v55, 0.0  ;;  %v726_v54 = vsel %vm269_vm6, %v717_v49, 0.0  ;;  %v1137_v55 = vld [vmem:[%s1794_s12] ss:$0 sm:$0xff] }
 0x3e4   :  { %724 = vadd.xlane.f32.xlu0 %v723_v40  ;;  %721 = vadd.xlane.f32.xlu1 %v720_v39  ;;  %v732_v59 = vsel %vm666_vm4, %v719_v1, 0.0  ;;  %v1323_v4 = vpack.c.bf16 %v960_v62, %v959_v3  ;;  %v861_v39 = vld [vmem:[%s1790_s4 + $0x8] sm:$0xf] }
 0x3e6   :  { %1324 = vmatprep.subr.bf16.mxu0 %v1323_v4 }
 0x3e7   :  { %v1386_v46 = vpop.eup %1385  ;;  %1326 = vmatpush3.bf16.msra.mxu0 %v1323_v4 }
 0x3e8   :  { %v827_v48 = vmul.f32 %v1386_v46, %v805_v10  ;;  %v826_v50 = vmul.f32 %v1386_v46, %v804_v7  ;;  %v829_v58 = vmul.f32 %v1386_v46, %v807_v15  ;;  %v828_v60 = vmul.f32 %v1386_v46, %v806_v13  ;;  %v626_v10 = vld [vmem:[%s1792_s9] sm:$0x3] }
 0x3e9   :  { %v830_v0 = vmul.f32 %v1386_v46, %v808_v33  ;;  %v736_v7 = vshrl.u32 %v735_v5, 7  ;;  %v1133_v46 = vld [vmem:[%s1793_s10] ss:$0 sm:$0xff] }
 0x3ea   :  { %v834_v52 = vsel %vm269_vm6, %v827_v48, 0.0  ;;  %v831_v53 = vsel %vm269_vm6, %v826_v50, 0.0  ;;  %v840_v61 = vsel %vm269_vm6, %v829_v58, 0.0  ;;  %v837_v63 = vsel %vm269_vm6, %v828_v60, 0.0 }
 0x3eb   :  { %835 = vadd.xlane.f32.xlu1 %v834_v52  ;;  %832 = vadd.xlane.f32.xlu0 %v831_v53  ;;  %v843_v57 = vsel %vm666_vm4, %v830_v0, 0.0  ;;  %v737_v8 = vsub.s32 0, %v736_v7  ;;  %v848_v9 = vsub.s32 1, %v736_v7 }
 0x3ed   :  { %v738_v13 = vrot.slane %v626_v10, %v737_v8  ;;  %v849_v14 = vrot.slane %v626_v10, %v848_v9 }
 0x3ef   :  { %730 = vadd.xlane.f32.xlu1 %v729_v56  ;;  %727 = vadd.xlane.f32.xlu0 %v726_v54 }
 0x3f3   :  { %841 = vadd.xlane.f32.xlu1 %v840_v61  ;;  %838 = vadd.xlane.f32.xlu0 %v837_v63 }
 0x3f7   :  { %844 = vadd.xlane.f32.xlu1 %v843_v57  ;;  %733 = vadd.xlane.f32.xlu0 %v732_v59 }
 0x471   :  { %v725_v11 = vpop.xlane.xlu0 %724  ;;  %v722_v12 = vpop.xlane.xlu1 %721 }
 0x472   :  { %v740_v17 = vmul.f32 %v738_v13, %v725_v11  ;;  %v739_v18 = vmul.f32 %v738_v13, %v722_v12 }
 0x478   :  { %v833_v15 = vpop.xlane.xlu0 %832  ;;  %v836_v16 = vpop.xlane.xlu1 %835 }
 0x479   :  { %v850_v33 = vmul.f32 %v849_v14, %v833_v15  ;;  %v851_v19 = vmul.f32 %v849_v14, %v836_v16 }
 0x47b   :  { %v855_v20 = vadd.f32 %v850_v33, %v739_v18  ;;  %v856_v21 = vadd.f32 %v851_v19, %v740_v17 }
 0x47c   :  { %v728_v34 = vpop.xlane.xlu0 %727  ;;  %v731_v22 = vpop.xlane.xlu1 %730 }
 0x47d   :  { %v862_v23 = vmul.f32 %v855_v20, %v1626_v41  ;;  %v863_v35 = vmul.f32 %v856_v21, %v1628_v43  ;;  %v741_v36 = vmul.f32 %v738_v13, %v728_v34  ;;  %v742_v26 = vmul.f32 %v738_v13, %v731_v22  ;;  %v1140_v34 = vld [vmem:[%s1795_s13] ss:$0 sm:$0xff] }
 0x47f   :  { %v1315_v6 = vpack.c.bf16 %v863_v35, %v862_v23  ;;  %v1141_v35 = vld [vmem:[%s1796_s14] ss:$0 sm:$0xff] }
 0x480   :  { %v839_v24 = vpop.xlane.xlu0 %838  ;;  %v842_v25 = vpop.xlane.xlu1 %841 }
 0x481   :  { %v852_v27 = vmul.f32 %v849_v14, %v839_v24  ;;  %v853_v28 = vmul.f32 %v849_v14, %v842_v25  ;;  %1316 = vmatprep.subr.bf16.mxu1 %v1315_v6 }
 0x482   :  { %1318 = vmatpush3.bf16.msra.mxu1 %v1315_v6 }
 0x483   :  { %v857_v29 = vadd.f32 %v852_v27, %v741_v36  ;;  %v858_v37 = vadd.f32 %v853_v28, %v742_v26 }
 0x484   :  { %v734_v32 = vpop.xlane.xlu0 %733  ;;  %v845_v42 = vpop.xlane.xlu1 %844 }
 0x485   :  { %v864_v44 = vmul.f32 %v857_v29, %v1630_v45  ;;  %v865_v31 = vmul.f32 %v858_v37, %v1632_v47  ;;  %v743_v41 = vmul.f32 %v738_v13, %v734_v32  ;;  %v854_v30 = vmul.f32 %v849_v14, %v845_v42  ;;  %v961_v45 = vld [vmem:[%s1791_s11 + $0x10] sm:$0xff]  ;;  %v962_v47 = vld [vmem:[%s1791_s11 + $0x18] sm:$0xff] }
 0x487   :  { %v859_v43 = vadd.f32 %v854_v30, %v743_v41  ;;  %v1319_v38 = vpack.c.bf16 %v865_v31, %v864_v44 }
 0x489   :  { %v866_v40 = vmul.f32 %v859_v43, %v1635_v51  ;;  %1320 = vmatprep.subr.bf16.mxu1 %v1319_v38  ;;  %v1327_v51 = vpack.c.bf16 %v962_v47, %v961_v45 }
 0x48a   :  { %1322 = vmatpush3.bf16.msra.mxu1 %v1319_v38 }
 0x48b   :  { %1281 = vmatprep.subr.msk.mxu1 %vm175_vm2, %v866_v40  ;;  %1328 = vmatprep.subr.bf16.mxu0 %v1327_v51 }
 0x48c   :  { %1330 = vmatpush3.bf16.msra.mxu0 %v1327_v51 }
 0x48e   :  { %1282 = vmatpush3.msk.msra.mxu1 %vm175_vm2, %v866_v40  ;;  %vm1054_vm2 = vcmask 125952  }
 0x48f   :  { %1284 = vmatmul.mubr.msk.f32.vlgmr.msra.gmra.mrb[10].mxu1 %vm874_vm5, %v861_v39 }
 0x562   :  { %v1285_v48 = vpop.f32.mrb[10].mxu1 }
 0x563   :  { %v950_v50 = vpop.f32.mrb[11].mxu1  ;;  %v956_v53 = vadd.f32 %v1285_v48, %v1133_v46 }
 0x564   :  { %v951_v52 = vadd.f32 %v1133_v46, %v950_v50 }
 0x566   :  { %1294 = vmatprep.mubr.msk.f32.mxu0 %vm520_vm8, %v951_v52 }
 0x567   :  { %1295 = vmatmul.mubr.msk.f32.vlgmr.msra.gmra.mrb[22].mxu0 %vm520_vm8, %v956_v53 }
 0x63a   :  { %v1296_v49 = vpop.f32.mrb[22].mxu0 }
 0x63b   :  { %v1048_v56 = vadd.f32 %v1296_v49, %v1137_v55  ;;  %v1042_v54 = vpop.f32.mrb[23].mxu0 }
 0x63c   :  { %v1043_v58 = vadd.f32 %v1137_v55, %v1042_v54 }
 0x63d   :  { %v1052_v60 = vmax.f32 %v1048_v56, 0.0 }
 0x63e   :  { %v1051_v61 = vmax.f32 %v1043_v58, 0.0 }
 0x63f   :  { %v1055_v63 = vsel %vm1054_vm2, %v1052_v60, 0.0 }
 0x640   :  { %v1053_v0 = vsel %vm71_vm0, %v1051_v61, 0.0 }
 0x641   :  { %v1056_v1 = vadd.f32 %v1055_v63, %v1053_v0 }
 0x643   :  { %v1057_v57 = vrot.slane %v1056_v1, 4 }
 0x645   :  { %v1058_v59 = vadd.f32 %v1057_v57, %v1056_v1 }
 0x647   :  { %v1059_v2 = vrot.slane %v1058_v59, 2 }
 0x649   :  { %v1060_v3 = vadd.f32 %v1059_v2, %v1058_v59 }
 0x64b   :  { %v1061_v62 = vrot.slane %v1060_v3, 1 }
 0x64d   :  { %v1062_v4 = vadd.f32 %v1061_v62, %v1060_v3 }
 0x64f   :  { %v1064_v5 = vmul.f32 0.083333336, %v1062_v4 }
 0x651   :  { %v1065_v7 = vsub.f32 %v1051_v61, %v1064_v5  ;;  %v1066_v8 = vsub.f32 %v1052_v60, %v1064_v5 }
 0x653   :  { %v1067_v9 = vmul.f32 %v1065_v7, %v1065_v7  ;;  %v1068_v10 = vmul.f32 %v1066_v8, %v1066_v8 }
 0x655   :  { %v1069_v11 = vsel %vm71_vm0, %v1067_v9, 0.0  ;;  %v1070_v12 = vsel %vm1054_vm2, %v1068_v10, 0.0 }
 0x656   :  { %v1071_v13 = vadd.f32 %v1070_v12, %v1069_v11 }
 0x658   :  { %v1072_v14 = vrot.slane %v1071_v13, 4 }
 0x65a   :  { %v1073_v15 = vadd.f32 %v1072_v14, %v1071_v13 }
 0x65c   :  { %v1074_v16 = vrot.slane %v1073_v15, 2 }
 0x65e   :  { %v1075_v17 = vadd.f32 %v1074_v16, %v1073_v15 }
 0x660   :  { %v1076_v18 = vrot.slane %v1075_v17, 1 }
 0x662   :  { %v1077_v33 = vadd.f32 %v1076_v18, %v1075_v17 }
 0x664   :  { %v1078_v19 = vmul.f32 0.083333336, %v1077_v33 }
 0x666   :  { %v1079_v20 = vadd.f32 1e-05, %v1078_v19 }
 0x668   :  { %1387 = vrsqrt.f32 %v1079_v20 }
 0x672   :  { %v1388_v21 = vpop.eup %1387 }
 0x673   :  { %v1081_v22 = vmul.f32 %v1388_v21, %v1065_v7  ;;  %v1082_v23 = vmul.f32 %v1388_v21, %v1066_v8 }
 0x675   :  { %v1090_v6 = vmul.f32 %v1140_v34, %v1081_v22  ;;  %v1091_v24 = vmul.f32 %v1140_v34, %v1082_v23 }
 0x677   :  { %v1099_v25 = vadd.f32 %v1141_v35, %v1090_v6  ;;  %v1100_v36 = vadd.f32 %v1141_v35, %v1091_v24 }
 0x679   :  { %1101 = vst.msk [vmem:[%s1797_s15] sm:$0xff] %vm71_vm0, %v1099_v25 }
 0x67a   :  { %1102 = vst.msk [vmem:[%s1797_s15 + $0x8] sm:$0xf] %vm1054_vm2, %v1100_v36 }

// kernel: gnn_forward.3
= control target key start
LH: loop header
LB: loop body
LE: loop exit
PB: predicated region body
PF: predicated region fallthrough
CT: control target
= control target key end

     0   :  { %vm70_vm0 = vcmask 64512   ;;  %v1382_v3 = vmov 0.0|0.0   ;;  %vm158_vm1 = vcmask 31744   ;;  %vm174_vm2 = vcmask 1043456   ;;  %s1770_s5 = inlined_call_operand.vmem [shape: f32[8,64], index: 5, kind: input, shape index: {}]   ;;  %s1771_s0 = inlined_call_operand.vmem [shape: f32[12,8], index: 0, kind: input, shape index: {}]   ;;  %s1772_s7 = inlined_call_operand.vmem [shape: f32[4,32], index: 7, kind: input, shape index: {}]   ;;  %s1773_s1 = inlined_call_operand.vmem [shape: f32[36,4], index: 1, kind: input, shape index: {}]   ;;  %s1774_s6 = inlined_call_operand.vmem [shape: f32[1,64], index: 6, kind: input, shape index: {}]   ;;  %s1775_s2 = inlined_call_operand.vmem [shape: f32[36,12], index: 2, kind: input, shape index: {}]   ;;  %s1776_s8 = inlined_call_operand.vmem [shape: f32[32,2], index: 8, kind: input, shape index: {}]   ;;  %s1777_s3 = inlined_call_operand.vmem [shape: f32[36,12], index: 3, kind: input, shape index: {}]   ;;  %s1778_s4 = inlined_call_operand.vmem [shape: f32[12,36], index: 4, kind: input, shape index: {}]   ;;  %s1779_s11 = inlined_call_operand.vmem [shape: f32[32,16], index: 11, kind: input, shape index: {}]   ;;  %s1780_s9 = inlined_call_operand.vmem [shape: f32[2,32], index: 9, kind: input, shape index: {}]   ;;  %s1781_s10 = inlined_call_operand.vmem [shape: f32[1,32], index: 10, kind: input, shape index: {}]   ;;  %s1782_s12 = inlined_call_operand.vmem [shape: f32[1,16], index: 12, kind: input, shape index: {}]   ;;  %s1783_s13 = inlined_call_operand.vmem [shape: f32[1,16], index: 13, kind: input, shape index: {}]   ;;  %s1784_s14 = inlined_call_operand.vmem [shape: f32[1,16], index: 14, kind: input, shape index: {}]   ;;  %s1785_s15 = inlined_call_operand.vmem [shape: f32[12,16], index: 15, kind: output, shape index: {}]  }
   0x1   :  { %v62_v0 = vld [vmem:[%s1770_s5] sm:$0xff]  ;;  %v51_v2 = vld [vmem:[%s1771_s0 + $0x8] sm:$0xf]  ;;  %v1383_v4 = vmov 0.0   ;;  %vm1384_vm3 = vmmov 0   ;;  %v154_v8 = vld [vmem:[%s1773_s1 + $0x10] sm:$0xff] }
   0x2   :  { %v50_v1 = vld [vmem:[%s1771_s0] sm:$0xff]  ;;  %1187 = vmatprep.subr.mxu0 %v62_v0  ;;  %1192 = vmatprep.subr.mxu1 %v1383_v4  ;;  %v153_v7 = vld [vmem:[%s1773_s1 + $0x8] sm:$0xff]  ;;  %v155_v9 = vld [vmem:[%s1773_s1 + $0x18] sm:$0xff]  ;;  %vm1385_vm4 = vmmov 1   ;;  %vm268_vm6 = vcmask 97280   ;;  %v1387_v47 = vmov 1  }
   0x3   :  { %1189 = vmatprep.mubr.msk.f32.mxu0 %vm70_vm0, %v50_v1  ;;  %1188 = vmatpush3.msra.mxu0 %v62_v0  ;;  %v157_v5 = vld [vmem:[%s1772_s7] sm:$0xf]  ;;  %vm1521_vm5 = vmpackc.low %vm174_vm2, %vm1385_vm4  ;;  %v53_v20 = vld [vmem:[%s1775_s2 + $0x8] sm:$0xff]  ;;  %v1388_v48 = vmov 0   ;;  %vm519_vm8 = vcmask 261120   ;;  %vm873_vm4 = vcmask 293888  }
   0x4   :  { %1190 = vmatmul.mubr.msk.f32.vlgmr.msra.gmra.mrb[0].mxu0 %vm70_vm0, %v51_v2  ;;  %1294 = vmatprep.subr.bf16.mxu0 %v1382_v3  ;;  %v152_v6 = vld [vmem:[%s1773_s1] sm:$0xff]  ;;  %v54_v21 = vld [vmem:[%s1775_s2 + $0x10] sm:$0xff]  ;;  %v516_v23 = vld [vmem:[%s1776_s8 + $0x8] sm:$0xff] }
   0x5   :  { %1194 = vmatprep.mubr.msk.f32.mxu1 %vm1384_vm3, %v1383_v4  ;;  %1193 = vmatpush3.msk.msra.mxu1 %vm174_vm2, %v157_v5  ;;  %v156_v10 = vld [vmem:[%s1773_s1 + $0x20] sm:$0xf]  ;;  %s1386_s1 = smov 96   ;;  %v55_v24 = vld [vmem:[%s1775_s2 + $0x18] sm:$0xff]  ;;  %v1577_v32 = vld [vmem:[%s1777_s3 + $0x8] sm:$0xff] }
   0x6   :  { %1213 = vmatprep.mubr.msk.f32.mxu0 %vm1384_vm3, %v1383_v4  ;;  %1195 = vmatmul.mubr.msk.f32.vlgmr.msra.gmra.mrb[0].mxu1 %vm158_vm1, %v152_v6  ;;  %v1107_v11 = vld [vmem:[%s1774_s6] ss:$0 sm:$0xff]  ;;  %v1586_v33 = vld [vmem:[%s1777_s3 + $0x10] sm:$0xff]  ;;  %v1595_v34 = vld [vmem:[%s1777_s3 + $0x18] sm:$0xff]  ;;  %vm627_vm15 = vcmp.gt.f32.partialorder %v1577_v32, 0.0 }
   0x7   :  { %1298 = vmatprep.subr.bf16.mxu1 %v1382_v3  ;;  %1197 = vmatprep.mubr.msk.f32.mxu1 %vm1384_vm3, %v1383_v4  ;;  %v52_v19 = vld [vmem:[%s1775_s2] sm:$0xff]  ;;  %v517_v36 = vld [vmem:[%s1776_s8 + $0x10] sm:$0xff]  ;;  %v518_v37 = vld [vmem:[%s1776_s8 + $0x18] sm:$0xff]  ;;  %vm629_vm14 = vcmp.gt.f32.partialorder %v1595_v34, 0.0  ;;  %vm628_vm0 = vcmp.gt.f32.partialorder %v1586_v33, 0.0 }
   0x8   :  { %v515_v22 = vld [vmem:[%s1776_s8] sm:$0xff]  ;;  %v1306_v38 = vpack.c.bf16 %v518_v37, %v517_v36  ;;  %1352 = vset.pattern.permute.xlu1 %v1387_v47  ;;  %1351 = vset.pattern.permute.xlu0 %v1388_v48 }
   0x9   :  { %v1303_v25 = vpack.c.bf16 %v516_v23, %v515_v22  ;;  %v56_v26 = vld [vmem:[%s1775_s2 + $0x20] sm:$0xf] }
   0xa   :  { %1198 = vmatmul.mubr.msk.f32.gmra.mrb[2].mxu1 %vm158_vm1, %v153_v7  ;;  %v1568_v31 = vld [vmem:[%s1777_s3] sm:$0xff] }
   0xb   :  { %1200 = vmatprep.mubr.msk.f32.mxu1 %vm1384_vm3, %v1383_v4  ;;  %v1604_v35 = vld [vmem:[%s1777_s3 + $0x20] sm:$0xf]  ;;  %vm626_vm13 = vcmp.gt.f32.partialorder %v1568_v31, 0.0 }
   0xe   :  { %1201 = vmatmul.mubr.msk.f32.gmra.mrb[4].mxu1 %vm158_vm1, %v154_v8 }
   0xf   :  { %1203 = vmatprep.mubr.msk.f32.mxu1 %vm1384_vm3, %v1383_v4 }
  0x12   :  { %1204 = vmatmul.mubr.msk.f32.gmra.mrb[6].mxu1 %vm158_vm1, %v155_v9 }
  0x13   :  { %1206 = vmatprep.mubr.msk.f32.mxu1 %vm1384_vm3, %v1383_v4 }
  0x16   :  { %1207 = vmatmul.mubr.msk.f32.gmra.mrb[8].mxu1 %vm158_vm1, %v156_v10  ;;  %vm630_vm1 = vcmp.gt.f32.partialorder %v1604_v35, 0.0 }
  0x17   :  { %1232 = vmatprep.mubr.msk.f32.mxu1 %vm1384_vm3, %v1383_v4 }
  0xd7   :  { %v1191_v12 = vpop.f32.mrb[0].mxu0 }
  0xd8   :  { %v149_v13 = vadd.f32 %v1191_v12, %v1107_v11  ;;  %v143_v14 = vpop.f32.mrb[1].mxu0 }
  0xd9   :  { %v144_v15 = vadd.f32 %v1107_v11, %v143_v14 }
  0xdb   :  { %v1295_v17 = vpack.c.bf16 %v149_v13, %v144_v15  ;;  %v1346_v18 = vpack.i.bf16 %v149_v13, %v144_v15 }
  0xdd   :  { %1347 = vrot.lane.b32.xlu0 %v1346_v18, %s1386_s1  ;;  %1297 = vmatpush3.bf16.msk.msra.mxu0 %vm1521_vm5, %v1295_v17 }
  0xde   :  { %1302 = vmatprep.subr.bf16.mxu0 %v1382_v3 }
  0xe0   :  { %1214 = vmatmul.mubr.msk.f32.vlgmr.msra.gmra.mrb[2].mxu0 %vm268_vm6, %v52_v19 }
  0xe1   :  { %1216 = vmatprep.mubr.msk.f32.mxu0 %vm1384_vm3, %v1383_v4  ;;  %1304 = vmatpush3.bf16.msra.mxu0 %v1303_v25 }
  0xe2   :  { %1305 = vmatprep.subr.bf16.mxu0 %v1382_v3 }
  0xe4   :  { %1217 = vmatmul.mubr.msk.f32.gmra.mrb[4].mxu0 %vm268_vm6, %v53_v20 }
  0xe5   :  { %1219 = vmatprep.mubr.msk.f32.mxu0 %vm1384_vm3, %v1383_v4  ;;  %1307 = vmatpush3.bf16.msra.mxu0 %v1306_v38 }
  0xe8   :  { %1220 = vmatmul.mubr.msk.f32.gmra.mrb[6].mxu0 %vm268_vm6, %v54_v21 }
  0xe9   :  { %1222 = vmatprep.mubr.msk.f32.mxu0 %vm1384_vm3, %v1383_v4 }
  0xec   :  { %1223 = vmatmul.mubr.msk.f32.gmra.mrb[8].mxu0 %vm268_vm6, %v55_v24 }
  0xed   :  { %1225 = vmatprep.mubr.msk.f32.mxu0 %vm1384_vm3, %v1383_v4 }
  0xf0   :  { %1226 = vmatmul.mubr.msk.f32.gmra.mrb[10].mxu0 %vm268_vm6, %v56_v26 }
  0xf1   :  { %1255 = vmatprep.mubr.msk.f32.mxu0 %vm1384_vm3, %v1383_v4 }
 0x14f   :  { %v1348_v27 = vpop.permute.xlu0 %1347 }
 0x150   :  { %v1350_v28 = vunpack.i.h.bf16 %v1348_v27  ;;  %v1349_v29 = vunpack.i.l.bf16 %v1348_v27 }
 0x152   :  { %v1299_v30 = vpack.c.bf16 %v1350_v28, %v1349_v29 }
 0x154   :  { %1301 = vmatpush3.bf16.msk.msra.mxu1 %vm1521_vm5, %v1299_v30  ;;  %vm1052_vm5 = vcmask 130048  }
 0x157   :  { %1233 = vmatmul.mubr.msk.f32.vlgmr.msra.gmra.mrb[0].mxu1 %vm268_vm6, %v1568_v31 }
 0x158   :  { %1235 = vmatprep.mubr.msk.f32.mxu1 %vm1384_vm3, %v1383_v4 }
 0x15b   :  { %1236 = vmatmul.mubr.msk.f32.gmra.mrb[2].mxu1 %vm268_vm6, %v1577_v32 }
 0x15c   :  { %1238 = vmatprep.mubr.msk.f32.mxu1 %vm1384_vm3, %v1383_v4 }
 0x15f   :  { %1239 = vmatmul.mubr.msk.f32.gmra.mrb[4].mxu1 %vm268_vm6, %v1586_v33 }
 0x160   :  { %1241 = vmatprep.mubr.msk.f32.mxu1 %vm1384_vm3, %v1383_v4 }
 0x163   :  { %1242 = vmatmul.mubr.msk.f32.gmra.mrb[6].mxu1 %vm268_vm6, %v1595_v34 }
 0x164   :  { %1244 = vmatprep.mubr.msk.f32.mxu1 %vm1384_vm3, %v1383_v4 }
 0x167   :  { %1245 = vmatmul.mubr.msk.f32.gmra.mrb[8].mxu1 %vm268_vm6, %v1604_v35 }
 0x1b3   :  { %v1614_v39 = vpop.f32.mrb[2].mxu0 }
 0x1b4   :  { %v1215_v40 = vpop.f32.mrb[3].mxu0 }
 0x1b7   :  { %v1616_v41 = vpop.f32.mrb[4].mxu0 }
 0x1b8   :  { %v1218_v42 = vpop.f32.mrb[5].mxu0 }
 0x1bb   :  { %v1618_v43 = vpop.f32.mrb[6].mxu0 }
 0x1bc   :  { %v1221_v44 = vpop.f32.mrb[7].mxu0 }
 0x1bf   :  { %v1620_v45 = vpop.f32.mrb[8].mxu0 }
 0x1c0   :  { %v1224_v46 = vpop.f32.mrb[9].mxu0 }
 0x1c3   :  { %v1623_v49 = vpop.f32.mrb[10].mxu0 }
 0x1c4   :  { %v1227_v50 = vpop.f32.mrb[11].mxu0 }
 0x22a   :  { %v466_v51 = vpop.f32.mrb[0].mxu1 }
 0x22b   :  { %v490_v52 = vadd.f32 %v466_v51, %v1614_v39  ;;  %v1234_v53 = vpop.f32.mrb[1].mxu1 }
 0x22d   :  { %vm500_vm7 = vcmp.gt.f32.partialorder %v490_v52, 0.0  ;;  %v505_v54 = vmul.f32 0.2, %v490_v52 }
 0x22e   :  { %v471_v55 = vpop.f32.mrb[2].mxu1 }
 0x22f   :  { %v510_v56 = vsel %vm500_vm7, %v490_v52, %v505_v54  ;;  %v491_v57 = vadd.f32 %v471_v55, %v1616_v41  ;;  %v1237_v58 = vpop.f32.mrb[3].mxu1 }
 0x230   :  { %1256 = vmatmul.mubr.msk.f32.vlgmr.msra.gmra.mrb[12].mxu0 %vm519_vm8, %v510_v56 }
 0x231   :  { %vm501_vm9 = vcmp.gt.f32.partialorder %v491_v57, 0.0  ;;  %v506_v59 = vmul.f32 0.2, %v491_v57  ;;  %1258 = vmatprep.mubr.msk.f32.mxu0 %vm1384_vm3, %v1383_v4 }
 0x232   :  { %v476_v60 = vpop.f32.mrb[4].mxu1 }
 0x233   :  { %v492_v61 = vadd.f32 %v476_v60, %v1618_v43  ;;  %v1240_v62 = vpop.f32.mrb[5].mxu1  ;;  %v511_v63 = vsel %vm501_vm9, %v491_v57, %v506_v59 }
 0x234   :  { %1259 = vmatmul.mubr.msk.f32.gmra.mrb[14].mxu0 %vm519_vm8, %v511_v63 }
 0x235   :  { %vm502_vm10 = vcmp.gt.f32.partialorder %v492_v61, 0.0  ;;  %v507_v0 = vmul.f32 0.2, %v492_v61  ;;  %1261 = vmatprep.mubr.msk.f32.mxu0 %vm1384_vm3, %v1383_v4 }
 0x236   :  { %v481_v1 = vpop.f32.mrb[6].mxu1 }
 0x237   :  { %v493_v2 = vadd.f32 %v481_v1, %v1620_v45  ;;  %v1243_v3 = vpop.f32.mrb[7].mxu1  ;;  %v512_v5 = vsel %vm502_vm10, %v492_v61, %v507_v0 }
 0x238   :  { %1262 = vmatmul.mubr.msk.f32.gmra.mrb[16].mxu0 %vm519_vm8, %v512_v5 }
 0x239   :  { %vm503_vm11 = vcmp.gt.f32.partialorder %v493_v2, 0.0  ;;  %v508_v6 = vmul.f32 0.2, %v493_v2  ;;  %1264 = vmatprep.mubr.msk.f32.mxu0 %vm1384_vm3, %v1383_v4 }
 0x23a   :  { %v486_v7 = vpop.f32.mrb[8].mxu1 }
 0x23b   :  { %v494_v8 = vadd.f32 %v486_v7, %v1623_v49  ;;  %v1246_v9 = vpop.f32.mrb[9].mxu1  ;;  %v513_v10 = vsel %vm503_vm11, %v493_v2, %v508_v6 }
 0x23c   :  { %1265 = vmatmul.mubr.msk.f32.gmra.mrb[18].mxu0 %vm519_vm8, %v513_v10 }
 0x23d   :  { %vm504_vm12 = vcmp.gt.f32.partialorder %v494_v8, 0.0  ;;  %v509_v11 = vmul.f32 0.2, %v494_v8  ;;  %1267 = vmatprep.mubr.msk.f32.mxu0 %vm1384_vm3, %v1383_v4  ;;  %vm665_vm3 = vcmask 93184  }
 0x23f   :  { %v514_v12 = vsel %vm504_vm12, %v494_v8, %v509_v11 }
 0x240   :  { %1268 = vmatmul.mubr.msk.f32.gmra.mrb[20].mxu0 %vm519_vm8, %v514_v12 }
 0x303   :  { %v601_v13 = vpop.f32.mrb[12].mxu0 }
 0x304   :  { %749 = vperm.xlu1 %1352, %v601_v13   ;;  %633 = vperm.xlu0 %1351, %v601_v13   ;;  %v1257_v14 = vpop.f32.mrb[13].mxu0 }
 0x307   :  { %v606_v15 = vpop.f32.mrb[14].mxu0 }
 0x308   :  { %753 = vperm.xlu1 %1352, %v606_v15   ;;  %638 = vperm.xlu0 %1351, %v606_v15   ;;  %v1260_v16 = vpop.f32.mrb[15].mxu0 }
 0x30b   :  { %v611_v17 = vpop.f32.mrb[16].mxu0 }
 0x30c   :  { %1353 = vset.pattern.permute.xlu1 %v1388_v48  ;;  %v1263_v18 = vpop.f32.mrb[17].mxu0 }
 0x30d   :  { %643 = vperm.xlu1 %1353, %v611_v17  }
 0x30f   :  { %v616_v19 = vpop.f32.mrb[18].mxu0 }
 0x310   :  { %648 = vperm.xlu0 %1351, %v616_v19   ;;  %v1266_v20 = vpop.f32.mrb[19].mxu0 }
 0x313   :  { %v621_v21 = vpop.f32.mrb[20].mxu0 }
 0x314   :  { %1354 = vset.pattern.permute.xlu0 %v1387_v47  ;;  %653 = vperm.xlu1 %1353, %v621_v21   ;;  %v1269_v4 = vpop.f32.mrb[21].mxu0 }
 0x315   :  { %757 = vperm.xlu0 %1354, %v611_v17  }
 0x318   :  { %1355 = vset.pattern.permute.xlu1 %v1387_v47 }
 0x319   :  { %765 = vperm.xlu1 %1355, %v621_v21  }
 0x31d   :  { %761 = vperm.xlu1 %1355, %v616_v19  }
 0x383   :  { %v750_v22 = vpop.permute.xlu1 %749  ;;  %v634_v23 = vpop.permute.xlu0 %633 }
 0x384   :  { %v656_v28 = vsel %vm626_vm13, %v634_v23, -1e+09  ;;  %v768_v47 = vsel %vm626_vm13, %v750_v22, -1e+09 }
 0x385   :  { %v661_v40 = vsel %vm268_vm6, %v656_v28, -inf  ;;  %v773_v56 = vsel %vm268_vm6, %v768_v47, -inf }
 0x387   :  { %v754_v24 = vpop.permute.xlu1 %753  ;;  %v639_v25 = vpop.permute.xlu0 %638 }
 0x388   :  { %v657_v36 = vsel %vm627_vm15, %v639_v25, -1e+09  ;;  %v769_v59 = vsel %vm627_vm15, %v754_v24, -1e+09 }
 0x389   :  { %v662_v48 = vsel %vm268_vm6, %v657_v36, -inf  ;;  %v774_v1 = vsel %vm268_vm6, %v769_v59, -inf }
 0x38c   :  { %v644_v26 = vpop.permute.xlu1 %643 }
 0x38d   :  { %v658_v37 = vsel %vm628_vm0, %v644_v26, -1e+09 }
 0x38e   :  { %v663_v50 = vsel %vm268_vm6, %v658_v37, -inf }
 0x38f   :  { %v649_v27 = vpop.permute.xlu0 %648 }
 0x390   :  { %v659_v29 = vsel %vm629_vm14, %v649_v27, -1e+09 }
 0x391   :  { %v664_v42 = vsel %vm268_vm6, %v659_v29, -inf }
 0x392   :  { %v669_v51 = vmax.f32 %v663_v50, %v664_v42 }
 0x393   :  { %v654_v30 = vpop.permute.xlu1 %653 }
 0x394   :  { %v660_v38 = vsel %vm630_vm1, %v654_v30, -1e+09  ;;  %v758_v53 = vpop.permute.xlu0 %757 }
 0x395   :  { %v666_v44 = vsel %vm665_vm3, %v660_v38, -inf  ;;  %v770_v60 = vsel %vm628_vm0, %v758_v53, -1e+09 }
 0x396   :  { %v667_v46 = vmax.f32 %v661_v40, %v666_v44  ;;  %v775_v3 = vsel %vm268_vm6, %v770_v60, -inf }
 0x398   :  { %v668_v52 = vmax.f32 %v667_v46, %v662_v48  ;;  %v766_v54 = vpop.permute.xlu1 %765 }
 0x399   :  { %v772_v55 = vsel %vm630_vm1, %v766_v54, -1e+09 }
 0x39a   :  { %v670_v57 = vmax.f32 %v668_v52, %v669_v51  ;;  %v777_v58 = vsel %vm665_vm3, %v772_v55, -inf }
 0x39b   :  { %v778_v61 = vmax.f32 %v773_v56, %v777_v58 }
 0x39c   :  { %v671_v62 = vrot.slane %v670_v57, 4  ;;  %v762_v63 = vpop.permute.xlu1 %761 }
 0x39d   :  { %v771_v0 = vsel %vm629_vm14, %v762_v63, -1e+09  ;;  %v779_v6 = vmax.f32 %v778_v61, %v774_v1 }
 0x39e   :  { %v672_v2 = vmax.f32 %v670_v57, %v671_v62  ;;  %v776_v5 = vsel %vm268_vm6, %v771_v0, -inf }
 0x39f   :  { %v780_v7 = vmax.f32 %v775_v3, %v776_v5 }
 0x3a0   :  { %v673_v8 = vrot.slane %v672_v2, 2 }
 0x3a1   :  { %v781_v9 = vmax.f32 %v779_v6, %v780_v7 }
 0x3a2   :  { %v674_v10 = vmax.f32 %v672_v2, %v673_v8 }
 0x3a3   :  { %v782_v11 = vrot.slane %v781_v9, 4 }
 0x3a4   :  { %v675_v12 = vrot.slane %v674_v10, 1 }
 0x3a5   :  { %v783_v13 = vmax.f32 %v781_v9, %v782_v11 }
 0x3a6   :  { %v676_v14 = vmax.f32 %v674_v10, %v675_v12 }
 0x3a7   :  { %v784_v15 = vrot.slane %v783_v13, 2 }
 0x3a8   :  { %v680_v16 = vsub.f32 %v659_v29, %v676_v14  ;;  %v681_v17 = vsub.f32 %v660_v38, %v676_v14  ;;  %v677_v18 = vsub.f32 %v656_v28, %v676_v14  ;;  %v678_v19 = vsub.f32 %v657_v36, %v676_v14 }
 0x3a9   :  { %v785_v20 = vmax.f32 %v783_v13, %v784_v15  ;;  %v679_v21 = vsub.f32 %v658_v37, %v676_v14 }
 0x3aa   :  { %v690_v4 = vmul.f32 1.442695, %v681_v17  ;;  %v682_v22 = vmul.f32 1.442695, %v677_v18  ;;  %v684_v24 = vmul.f32 1.442695, %v678_v19 }
 0x3ab   :  { %v786_v23 = vrot.slane %v785_v20, 1  ;;  %v686_v25 = vmul.f32 1.442695, %v679_v21  ;;  %v688_v26 = vmul.f32 1.442695, %v680_v16 }
 0x3ac   :  { %1356 = vpow2.f32 %v690_v4 }
 0x3ad   :  { %v787_v27 = vmax.f32 %v785_v20, %v786_v23  ;;  %1358 = vpow2.f32 %v682_v22 }
 0x3ae   :  { %1360 = vpow2.f32 %v684_v24 }
 0x3af   :  { %v790_v30 = vsub.f32 %v770_v60, %v787_v27  ;;  %v791_v40 = vsub.f32 %v771_v0, %v787_v27  ;;  %1362 = vpow2.f32 %v686_v25  ;;  %v792_v42 = vsub.f32 %v772_v55, %v787_v27 }
 0x3b0   :  { %1364 = vpow2.f32 %v688_v26  ;;  %v788_v29 = vsub.f32 %v768_v47, %v787_v27  ;;  %v789_v28 = vsub.f32 %v769_v59, %v787_v27 }
 0x3b1   :  { %v799_v36 = vmul.f32 1.442695, %v791_v40  ;;  %v797_v44 = vmul.f32 1.442695, %v790_v30  ;;  %v801_v46 = vmul.f32 1.442695, %v792_v42 }
 0x3b2   :  { %v793_v38 = vmul.f32 1.442695, %v788_v29  ;;  %v795_v37 = vmul.f32 1.442695, %v789_v28 }
 0x3b3   :  { %1366 = vpow2.f32 %v799_v36 }
 0x3b4   :  { %1368 = vpow2.f32 %v793_v38 }
 0x3b5   :  { %1370 = vpow2.f32 %v795_v37 }
 0x3b6   :  { %v1357_v48 = vpop.eup %1356  ;;  %1372 = vpow2.f32 %v797_v44 }
 0x3b7   :  { %v1359_v50 = vpop.eup %1358  ;;  %1374 = vpow2.f32 %v801_v46  ;;  %v1687_v60 = vmul.f32 %v1357_v48, %v1604_v35 }
 0x3b8   :  { %v1361_v51 = vpop.eup %1360  ;;  %v692_v52 = vmul.f32 %v1359_v50, %v1568_v31 }
 0x3b9   :  { %v1363_v53 = vpop.eup %1362  ;;  %v693_v54 = vmul.f32 %v1361_v51, %v1577_v32  ;;  %v704_v7 = vsel %vm665_vm3, %v1687_v60, 0.0 }
 0x3ba   :  { %v1365_v47 = vpop.eup %1364  ;;  %v694_v55 = vmul.f32 %v1363_v53, %v1586_v33  ;;  %v697_v56 = vsel %vm268_vm6, %v692_v52, 0.0 }
 0x3bb   :  { %v695_v57 = vmul.f32 %v1365_v47, %v1595_v34  ;;  %v698_v58 = vsel %vm268_vm6, %v693_v54, 0.0 }
 0x3bc   :  { %v699_v59 = vadd.f32 %v698_v58, %v697_v56  ;;  %v700_v61 = vsel %vm268_vm6, %v694_v55, 0.0 }
 0x3bd   :  { %v1367_v62 = vpop.eup %1366  ;;  %v702_v1 = vsel %vm268_vm6, %v695_v57, 0.0 }
 0x3be   :  { %v701_v63 = vadd.f32 %v700_v61, %v699_v59  ;;  %v1369_v0 = vpop.eup %1368  ;;  %v806_v13 = vmul.f32 %v1367_v62, %v1595_v34 }
 0x3bf   :  { %v1371_v2 = vpop.eup %1370  ;;  %v803_v5 = vmul.f32 %v1369_v0, %v1568_v31  ;;  %v859_v0 = vld [vmem:[%s1778_s4] sm:$0xff] }
 0x3c0   :  { %v703_v3 = vadd.f32 %v702_v1, %v701_v63  ;;  %v1373_v6 = vpop.eup %1372  ;;  %v804_v8 = vmul.f32 %v1371_v2, %v1577_v32  ;;  %v813_v32 = vsel %vm268_vm6, %v806_v13, 0.0  ;;  %1280 = vmatprep.mubr.msk.f32.mxu1 %vm873_vm4, %v859_v0  ;;  %v958_v1 = vld [vmem:[%s1779_s11] sm:$0xff] }
 0x3c1   :  { %v1375_v9 = vpop.eup %1374  ;;  %v805_v11 = vmul.f32 %v1373_v6, %v1586_v33  ;;  %v808_v12 = vsel %vm268_vm6, %v803_v5, 0.0 }
 0x3c2   :  { %v705_v10 = vadd.f32 %v704_v7, %v703_v3  ;;  %v809_v14 = vsel %vm268_vm6, %v804_v8, 0.0  ;;  %v807_v31 = vmul.f32 %v1375_v9, %v1604_v35  ;;  %v734_v3 = vlaneseq }
 0x3c3   :  { %v810_v16 = vadd.f32 %v809_v14, %v808_v12  ;;  %v811_v17 = vsel %vm268_vm6, %v805_v11, 0.0 }
 0x3c4   :  { %v706_v15 = vrot.slane %v705_v10, 4  ;;  %v815_v33 = vsel %vm665_vm3, %v807_v31, 0.0 }
 0x3c5   :  { %v812_v19 = vadd.f32 %v811_v17, %v810_v16 }
 0x3c6   :  { %v707_v18 = vadd.f32 %v706_v15, %v705_v10 }
 0x3c7   :  { %v814_v21 = vadd.f32 %v813_v32, %v812_v19 }
 0x3c8   :  { %v708_v20 = vrot.slane %v707_v18, 2 }
 0x3c9   :  { %v816_v22 = vadd.f32 %v815_v33, %v814_v21 }
 0x3ca   :  { %v709_v4 = vadd.f32 %v708_v20, %v707_v18 }
 0x3cb   :  { %v817_v34 = vrot.slane %v816_v22, 4 }
 0x3cc   :  { %v710_v23 = vrot.slane %v709_v4, 1 }
 0x3cd   :  { %v818_v25 = vadd.f32 %v817_v34, %v816_v22 }
 0x3ce   :  { %v711_v24 = vadd.f32 %v710_v23, %v709_v4 }
 0x3cf   :  { %v819_v27 = vrot.slane %v818_v25, 2 }
 0x3d0   :  { %v712_v26 = vmax.f32 %v711_v24, 1e-16 }
 0x3d1   :  { %v820_v35 = vadd.f32 %v819_v27, %v818_v25 }
 0x3d2   :  { %1376 = vrcp.f32 %v712_v26 }
 0x3d3   :  { %v821_v30 = vrot.slane %v820_v35, 1 }
 0x3d5   :  { %v822_v40 = vadd.f32 %v821_v30, %v820_v35 }
 0x3d7   :  { %v823_v42 = vmax.f32 %v822_v40, 1e-16 }
 0x3d9   :  { %1378 = vrcp.f32 %v823_v42 }
 0x3dc   :  { %v1377_v29 = vpop.eup %1376 }
 0x3dd   :  { %v715_v28 = vmul.f32 %v1377_v29, %v693_v54  ;;  %v714_v36 = vmul.f32 %v1377_v29, %v692_v52  ;;  %v717_v53 = vmul.f32 %v1377_v29, %v695_v57  ;;  %v716_v47 = vmul.f32 %v1377_v29, %v694_v55 }
 0x3de   :  { %v718_v63 = vmul.f32 %v1377_v29, %v1687_v60  ;;  %v959_v60 = vld [vmem:[%s1779_s11 + $0x8] sm:$0xff] }
 0x3df   :  { %v722_v38 = vsel %vm268_vm6, %v715_v28, 0.0  ;;  %v719_v37 = vsel %vm268_vm6, %v714_v36, 0.0  ;;  %v728_v54 = vsel %vm268_vm6, %v717_v53, 0.0  ;;  %v725_v52 = vsel %vm268_vm6, %v716_v47, 0.0  ;;  %v1137_v53 = vld [vmem:[%s1782_s12] ss:$0 sm:$0xff] }
 0x3e0   :  { %723 = vadd.xlane.f32.xlu0 %v722_v38  ;;  %720 = vadd.xlane.f32.xlu1 %v719_v37  ;;  %v731_v57 = vsel %vm665_vm3, %v718_v63, 0.0  ;;  %v1316_v2 = vpack.c.bf16 %v959_v60, %v958_v1  ;;  %v860_v37 = vld [vmem:[%s1778_s4 + $0x8] sm:$0xf] }
 0x3e2   :  { %1317 = vmatprep.subr.bf16.mxu0 %v1316_v2 }
 0x3e3   :  { %v1379_v44 = vpop.eup %1378  ;;  %1319 = vmatpush3.bf16.msra.mxu0 %v1316_v2 }
 0x3e4   :  { %v826_v46 = vmul.f32 %v1379_v44, %v804_v8  ;;  %v825_v48 = vmul.f32 %v1379_v44, %v803_v5  ;;  %v828_v56 = vmul.f32 %v1379_v44, %v806_v13  ;;  %v827_v58 = vmul.f32 %v1379_v44, %v805_v11  ;;  %v625_v8 = vld [vmem:[%s1780_s9] sm:$0x3] }
 0x3e5   :  { %v829_v62 = vmul.f32 %v1379_v44, %v807_v31  ;;  %v735_v5 = vshrl.u32 %v734_v3, 7  ;;  %v1133_v44 = vld [vmem:[%s1781_s10] ss:$0 sm:$0xff] }
 0x3e6   :  { %v833_v50 = vsel %vm268_vm6, %v826_v46, 0.0  ;;  %v830_v51 = vsel %vm268_vm6, %v825_v48, 0.0  ;;  %v839_v59 = vsel %vm268_vm6, %v828_v56, 0.0  ;;  %v836_v61 = vsel %vm268_vm6, %v827_v58, 0.0 }
 0x3e7   :  { %834 = vadd.xlane.f32.xlu1 %v833_v50  ;;  %831 = vadd.xlane.f32.xlu0 %v830_v51  ;;  %v842_v55 = vsel %vm665_vm3, %v829_v62, 0.0  ;;  %v736_v6 = vsub.s32 0, %v735_v5  ;;  %v847_v7 = vsub.s32 1, %v735_v5 }
 0x3e9   :  { %v737_v11 = vrot.slane %v625_v8, %v736_v6  ;;  %v848_v12 = vrot.slane %v625_v8, %v847_v7 }
 0x3eb   :  { %729 = vadd.xlane.f32.xlu1 %v728_v54  ;;  %726 = vadd.xlane.f32.xlu0 %v725_v52 }
 0x3ef   :  { %840 = vadd.xlane.f32.xlu1 %v839_v59  ;;  %837 = vadd.xlane.f32.xlu0 %v836_v61 }
 0x3f3   :  { %843 = vadd.xlane.f32.xlu1 %v842_v55  ;;  %732 = vadd.xlane.f32.xlu0 %v731_v57 }
 0x46d   :  { %v724_v9 = vpop.xlane.xlu0 %723  ;;  %v721_v10 = vpop.xlane.xlu1 %720 }
 0x46e   :  { %v739_v15 = vmul.f32 %v737_v11, %v724_v9  ;;  %v738_v16 = vmul.f32 %v737_v11, %v721_v10 }
 0x474   :  { %v832_v13 = vpop.xlane.xlu0 %831  ;;  %v835_v14 = vpop.xlane.xlu1 %834 }
 0x475   :  { %v849_v31 = vmul.f32 %v848_v12, %v832_v13  ;;  %v850_v17 = vmul.f32 %v848_v12, %v835_v14 }
 0x477   :  { %v854_v18 = vadd.f32 %v849_v31, %v738_v16  ;;  %v855_v19 = vadd.f32 %v850_v17, %v739_v15 }
 0x478   :  { %v727_v32 = vpop.xlane.xlu0 %726  ;;  %v730_v20 = vpop.xlane.xlu1 %729 }
 0x479   :  { %v861_v21 = vmul.f32 %v854_v18, %v1614_v39  ;;  %v862_v33 = vmul.f32 %v855_v19, %v1616_v41  ;;  %v740_v34 = vmul.f32 %v737_v11, %v727_v32  ;;  %v741_v24 = vmul.f32 %v737_v11, %v730_v20  ;;  %v1140_v32 = vld [vmem:[%s1783_s13] ss:$0 sm:$0xff] }
 0x47b   :  { %v1308_v4 = vpack.c.bf16 %v862_v33, %v861_v21  ;;  %v1141_v33 = vld [vmem:[%s1784_s14] ss:$0 sm:$0xff] }
 0x47c   :  { %v838_v22 = vpop.xlane.xlu0 %837  ;;  %v841_v23 = vpop.xlane.xlu1 %840 }
 0x47d   :  { %v851_v25 = vmul.f32 %v848_v12, %v838_v22  ;;  %v852_v26 = vmul.f32 %v848_v12, %v841_v23  ;;  %1309 = vmatprep.subr.bf16.mxu1 %v1308_v4 }
 0x47e   :  { %1311 = vmatpush3.bf16.msra.mxu1 %v1308_v4 }
 0x47f   :  { %v856_v27 = vadd.f32 %v851_v25, %v740_v34  ;;  %v857_v35 = vadd.f32 %v852_v26, %v741_v24 }
 0x480   :  { %v733_v30 = vpop.xlane.xlu0 %732  ;;  %v844_v40 = vpop.xlane.xlu1 %843 }
 0x481   :  { %v863_v42 = vmul.f32 %v856_v27, %v1618_v43  ;;  %v864_v29 = vmul.f32 %v857_v35, %v1620_v45  ;;  %v742_v39 = vmul.f32 %v737_v11, %v733_v30  ;;  %v853_v28 = vmul.f32 %v848_v12, %v844_v40  ;;  %v960_v43 = vld [vmem:[%s1779_s11 + $0x10] sm:$0xff]  ;;  %v961_v45 = vld [vmem:[%s1779_s11 + $0x18] sm:$0xff] }
 0x483   :  { %v858_v41 = vadd.f32 %v853_v28, %v742_v39  ;;  %v1312_v36 = vpack.c.bf16 %v864_v29, %v863_v42 }
 0x485   :  { %v865_v38 = vmul.f32 %v858_v41, %v1623_v49  ;;  %1313 = vmatprep.subr.bf16.mxu1 %v1312_v36  ;;  %v1320_v49 = vpack.c.bf16 %v961_v45, %v960_v43 }
 0x486   :  { %1315 = vmatpush3.bf16.msra.mxu1 %v1312_v36 }
 0x487   :  { %1278 = vmatprep.subr.msk.mxu1 %vm174_vm2, %v865_v38  ;;  %1321 = vmatprep.subr.bf16.mxu0 %v1320_v49 }
 0x488   :  { %1323 = vmatpush3.bf16.msra.mxu0 %v1320_v49 }
 0x48a   :  { %1279 = vmatpush3.msk.msra.mxu1 %vm174_vm2, %v865_v38  ;;  %vm1054_vm2 = vcmask 125952  }
 0x48b   :  { %1281 = vmatmul.mubr.msk.f32.vlgmr.msra.gmra.mrb[10].mxu1 %vm873_vm4, %v860_v37 }
 0x55e   :  { %v1282_v46 = vpop.f32.mrb[10].mxu1 }
 0x55f   :  { %v949_v48 = vpop.f32.mrb[11].mxu1  ;;  %v955_v51 = vadd.f32 %v1282_v46, %v1133_v44 }
 0x560   :  { %v950_v50 = vadd.f32 %v1133_v44, %v949_v48 }
 0x562   :  { %1291 = vmatprep.mubr.msk.f32.mxu0 %vm519_vm8, %v950_v50 }
 0x563   :  { %1292 = vmatmul.mubr.msk.f32.vlgmr.msra.gmra.mrb[22].mxu0 %vm519_vm8, %v955_v51 }
 0x636   :  { %v1293_v47 = vpop.f32.mrb[22].mxu0 }
 0x637   :  { %v1047_v54 = vadd.f32 %v1293_v47, %v1137_v53  ;;  %v1041_v52 = vpop.f32.mrb[23].mxu0 }
 0x638   :  { %v1042_v56 = vadd.f32 %v1137_v53, %v1041_v52 }
 0x639   :  { %v1051_v58 = vmax.f32 %v1047_v54, 0.0 }
 0x63a   :  { %v1050_v59 = vmax.f32 %v1042_v56, 0.0 }
 0x63b   :  { %v1055_v61 = vsel %vm1054_vm2, %v1051_v58, 0.0 }
 0x63c   :  { %v1053_v62 = vsel %vm1052_vm5, %v1050_v59, 0.0 }
 0x63d   :  { %v1056_v63 = vadd.f32 %v1055_v61, %v1053_v62 }
 0x63f   :  { %v1057_v55 = vrot.slane %v1056_v63, 4 }
 0x641   :  { %v1058_v57 = vadd.f32 %v1057_v55, %v1056_v63 }
 0x643   :  { %v1059_v0 = vrot.slane %v1058_v57, 2 }
 0x645   :  { %v1060_v1 = vadd.f32 %v1059_v0, %v1058_v57 }
 0x647   :  { %v1061_v60 = vrot.slane %v1060_v1, 1 }
 0x649   :  { %v1062_v2 = vadd.f32 %v1061_v60, %v1060_v1 }
 0x64b   :  { %v1064_v3 = vmul.f32 0.083333336, %v1062_v2 }
 0x64d   :  { %v1065_v5 = vsub.f32 %v1050_v59, %v1064_v3  ;;  %v1066_v6 = vsub.f32 %v1051_v58, %v1064_v3 }
 0x64f   :  { %v1067_v7 = vmul.f32 %v1065_v5, %v1065_v5  ;;  %v1068_v8 = vmul.f32 %v1066_v6, %v1066_v6 }
 0x651   :  { %v1069_v9 = vsel %vm1052_vm5, %v1067_v7, 0.0  ;;  %v1070_v10 = vsel %vm1054_vm2, %v1068_v8, 0.0 }
 0x652   :  { %v1071_v11 = vadd.f32 %v1070_v10, %v1069_v9 }
 0x654   :  { %v1072_v12 = vrot.slane %v1071_v11, 4 }
 0x656   :  { %v1073_v13 = vadd.f32 %v1072_v12, %v1071_v11 }
 0x658   :  { %v1074_v14 = vrot.slane %v1073_v13, 2 }
 0x65a   :  { %v1075_v15 = vadd.f32 %v1074_v14, %v1073_v13 }
 0x65c   :  { %v1076_v16 = vrot.slane %v1075_v15, 1 }
 0x65e   :  { %v1077_v31 = vadd.f32 %v1076_v16, %v1075_v15 }
 0x660   :  { %v1078_v17 = vmul.f32 0.083333336, %v1077_v31 }
 0x662   :  { %v1079_v18 = vadd.f32 1e-05, %v1078_v17 }
 0x664   :  { %1380 = vrsqrt.f32 %v1079_v18 }
 0x66e   :  { %v1381_v19 = vpop.eup %1380 }
 0x66f   :  { %v1081_v20 = vmul.f32 %v1381_v19, %v1065_v5  ;;  %v1082_v21 = vmul.f32 %v1381_v19, %v1066_v6 }
 0x671   :  { %v1090_v4 = vmul.f32 %v1140_v32, %v1081_v20  ;;  %v1091_v22 = vmul.f32 %v1140_v32, %v1082_v21 }
 0x673   :  { %v1099_v23 = vadd.f32 %v1141_v33, %v1090_v4  ;;  %v1100_v34 = vadd.f32 %v1141_v33, %v1091_v22 }
 0x675   :  { %1101 = vst.msk [vmem:[%s1785_s15] sm:$0xff] %vm1052_vm5, %v1099_v23 }
 0x676   :  { %1102 = vst.msk [vmem:[%s1785_s15 + $0x8] sm:$0xf] %vm1054_vm2, %v1100_v34 }

// kernel: gnn_forward.5
= control target key start
LH: loop header
LB: loop body
LE: loop exit
PB: predicated region body
PF: predicated region fallthrough
CT: control target
= control target key end

     0   :  { %vm61_vm0 = vcmask 130048   ;;  %v716_v6 = vmov 0   ;;  %vm157_vm3 = vcmask 15360   ;;  %vm159_vm4 = vcmask 11264   ;;  %s877_s4 = inlined_call_operand.vmem [shape: f32[16,1], index: 4, kind: input, shape index: {}]   ;;  %s878_s0 = inlined_call_operand.vmem [shape: f32[12,16], index: 0, kind: input, shape index: {}]   ;;  %s879_s5 = inlined_call_operand.<no memory space> [shape: f32[1,1], index: 5, kind: input, shape index: {}]   ;;  %s880_s1 = inlined_call_operand.vmem [shape: f32[12,2], index: 1, kind: input, shape index: {}]   ;;  %s881_s7 = inlined_call_operand.vmem [shape: f32[2,32], index: 7, kind: input, shape index: {}]   ;;  %s882_s6 = inlined_call_operand.vmem [shape: f32[16,32], index: 6, kind: input, shape index: {}]   ;;  %s883_s2 = inlined_call_operand.vmem [shape: f32[2,12], index: 2, kind: input, shape index: {}]   ;;  %s884_s3 = inlined_call_operand.vmem [shape: f32[2,2], index: 3, kind: input, shape index: {}]   ;;  %s885_s9 = inlined_call_operand.vmem [shape: f32[32,8], index: 9, kind: input, shape index: {}]   ;;  %s886_s8 = inlined_call_operand.vmem [shape: f32[1,32], index: 8, kind: input, shape index: {}]   ;;  %s887_s11 = inlined_call_operand.vmem [shape: f32[8,1], index: 11, kind: input, shape index: {}]   ;;  %s888_s12 = inlined_call_operand.<no memory space> [shape: f32[1,1], index: 12, kind: input, shape index: {}]   ;;  %s889_s10 = inlined_call_operand.vmem [shape: f32[1,8], index: 10, kind: input, shape index: {}]   ;;  %s890_s13 = inlined_call_operand.vmem [shape: f32[2,1], index: 13, kind: output, shape index: {}]  }
   0x1   :  { %v52_v0 = vld [vmem:[%s877_s4] sm:$0xff]  ;;  %v53_v1 = vld [vmem:[%s877_s4 + $0x8] sm:$0xff]  ;;  %v18_v3 = vstv %s879_s5  ;;  %709 = vset.pattern.permute.xlu0 %v716_v6  ;;  %v717_v50 = vmov 0.0|0.0   ;;  %vm718_vm5 = vmmov 0   ;;  %v719_v51 = vmov 0.0   ;;  %v441_v6 = vld [vmem:[%s885_s9 + $0x10] sm:$0xff] }
   0x2   :  { %v800_v2 = vld [vmem:[%s878_s0] sm:$0xff]  ;;  %v687_v4 = vpack.c.bf16 %v53_v1, %v52_v0  ;;  %19 = vst [vmem:[#allocation2] sm:$0x1] %v18_v3  ;;  %v810_v5 = vld [vmem:[%s878_s0 + $0x8] sm:$0xf]  ;;  %691 = vmatprep.subr.bf16.mxu1 %v717_v50  ;;  %656 = vmatprep.mubr.msk.f32.mxu1 %vm718_vm5, %v719_v51  ;;  %vm283_vm6 = vcmask 1041408  }
   0x3   :  { %649 = vmatprep.mubr.msk.f32.mxu0 %vm61_vm0, %v800_v2  ;;  %v50_v12 = vld [vmem:[%s880_s1] sm:$0xff]  ;;  %v51_v13 = vld [vmem:[%s880_s1 + $0x8] sm:$0xf]  ;;  %vm202_vm7 = vcmask 1043456   ;;  %vm720_vm8 = vmmov 1   ;;  %vm198_vm10 = vcmask 97280  }
   0x4   :  { %688 = vmatprep.subr.bf16.mxu0 %v687_v4  ;;  %vm143_vm1 = vcmp.gt.f32.partialorder %v50_v12, 0.0  ;;  %vm144_vm2 = vcmp.gt.f32.partialorder %v51_v13, 0.0  ;;  %v279_v52 = vld [vmem:[%s881_s7] sm:$0x3]  ;;  %vm693_vm9 = vmpackc.low %vm202_vm7, %vm720_vm8  ;;  %v277_v58 = vld [vmem:[%s882_s6 + $0x8] sm:$0xff]  ;;  %vm450_vm11 = vcmask 261120  }
   0x5   :  { %690 = vmatpush3.bf16.msra.mxu0 %v687_v4  ;;  %v276_v57 = vld [vmem:[%s882_s6] sm:$0xff]  ;;  %vm533_vm12 = vcmask 64512   ;;  %vm607_vm13 = vcmask 1024  }
   0x6   :  { %659 = vmatprep.subr.mxu0 %v719_v51  ;;  %v195_v60 = vld [vmem:[%s883_s2] sm:$0x3]  ;;  %v696_v61 = vpack.c.bf16 %v277_v58, %v276_v57 }
   0x7   :  { %v278_v62 = vld [vmem:[%s884_s3] sm:$0x3] }
   0x8   :  { %650 = vmatmul.mubr.msk.f32.vlgmr.msra.gmra.mrb[0].mxu0 %vm61_vm0, %v810_v5  ;;  %v439_v1 = vld [vmem:[%s885_s9] sm:$0xff] }
   0x9   :  { %v613_v7 = vld [vmem:[#allocation2] ss:$0 sm:$0xff]  ;;  %661 = vmatprep.mubr.msk.f32.mxu0 %vm718_vm5, %v719_v51  ;;  %660 = vmatpush3.msk.msra.mxu0 %vm283_vm6, %v279_v52 }
   0xa   :  { %698 = vmatprep.subr.bf16.mxu0 %v717_v50 }
   0xc   :  { %662 = vmatmul.mubr.msk.f32.vlgmr.msra.gmra.mrb[2].mxu0 %vm157_vm3, %v278_v62 }
   0xd   :  { %679 = vmatprep.mubr.msk.f32.mxu0 %vm718_vm5, %v719_v51 }
  0xdb   :  { %v651_v8 = vpop.f32.mrb[0].mxu0 }
  0xdc   :  { %v134_v9 = vpop.f32.mrb[1].mxu0  ;;  %v140_v11 = vadd.f32 %v651_v8, %v613_v7 }
  0xdd   :  { %v135_v10 = vadd.f32 %v613_v7, %v134_v9  ;;  %v442_v7 = vld [vmem:[%s885_s9 + $0x18] sm:$0xff] }
  0xde   :  { %v702_v8 = vpack.c.bf16 %v442_v7, %v441_v6 }
  0xdf   :  { %147 = vperm.xlu0 %709, %v135_v10   ;;  %v353_v4 = vpop.f32.mrb[2].mxu0  ;;  %v621_v10 = vld [vmem:[%s886_s8] ss:$0 sm:$0xff] }
  0xe3   :  { %152 = vperm.xlu0 %709, %v140_v11  }
 0x15e   :  { %v148_v14 = vpop.permute.xlu0 %147 }
 0x15f   :  { %v155_v15 = vsel %vm143_vm1, %v148_v14, -1e+09 }
 0x160   :  { %v158_v18 = vsel %vm157_vm3, %v155_v15, -inf }
 0x162   :  { %v153_v16 = vpop.permute.xlu0 %152 }
 0x163   :  { %v156_v17 = vsel %vm144_vm2, %v153_v16, -1e+09  ;;  %v20_v16 = vstv %s888_s12 }
 0x164   :  { %v160_v19 = vsel %vm159_vm4, %v156_v17, -inf  ;;  %21 = vst [vmem:[#allocation3] sm:$0x1] %v20_v16 }
 0x165   :  { %v161_v20 = vmax.f32 %v158_v18, %v160_v19 }
 0x167   :  { %v162_v21 = vrot.slane %v161_v20, 4 }
 0x169   :  { %v163_v22 = vmax.f32 %v161_v20, %v162_v21 }
 0x16b   :  { %v164_v23 = vrot.slane %v163_v22, 2 }
 0x16d   :  { %v165_v24 = vmax.f32 %v163_v22, %v164_v23  ;;  %v624_v22 = vld [vmem:[#allocation3] ss:$0 sm:$0xff] }
 0x16f   :  { %v166_v25 = vrot.slane %v165_v24, 1 }
 0x171   :  { %v167_v26 = vmax.f32 %v165_v24, %v166_v25 }
 0x173   :  { %v168_v27 = vsub.f32 %v155_v15, %v167_v26  ;;  %v169_v28 = vsub.f32 %v156_v17, %v167_v26  ;;  %v525_v15 = vld [vmem:[%s887_s11] sm:$0xff] }
 0x174   :  { %v622_v17 = vld [vmem:[%s889_s10] ss:$0 sm:$0xff] }
 0x175   :  { %v170_v29 = vmul.f32 1.442695, %v168_v27  ;;  %v172_v30 = vmul.f32 1.442695, %v169_v28 }
 0x177   :  { %710 = vpow2.f32 %v170_v29 }
 0x178   :  { %712 = vpow2.f32 %v172_v30 }
 0x181   :  { %v711_v31 = vpop.eup %710 }
 0x182   :  { %v713_v32 = vpop.eup %712  ;;  %v174_v33 = vmul.f32 %v711_v31, %v50_v12 }
 0x183   :  { %v175_v34 = vmul.f32 %v713_v32, %v51_v13 }
 0x184   :  { %v176_v35 = vsel %vm157_vm3, %v174_v33, 0.0 }
 0x185   :  { %v177_v36 = vsel %vm159_vm4, %v175_v34, 0.0 }
 0x186   :  { %v178_v37 = vadd.f32 %v177_v36, %v176_v35 }
 0x188   :  { %v179_v38 = vrot.slane %v178_v37, 4 }
 0x18a   :  { %v180_v39 = vadd.f32 %v179_v38, %v178_v37 }
 0x18c   :  { %v181_v40 = vrot.slane %v180_v39, 2 }
 0x18e   :  { %v182_v41 = vadd.f32 %v181_v40, %v180_v39 }
 0x190   :  { %v183_v42 = vrot.slane %v182_v41, 1 }
 0x192   :  { %v184_v43 = vadd.f32 %v183_v42, %v182_v41 }
 0x194   :  { %v185_v44 = vmax.f32 %v184_v43, 1e-16 }
 0x196   :  { %714 = vrcp.f32 %v185_v44 }
 0x1a0   :  { %v715_v45 = vpop.eup %714 }
 0x1a1   :  { %v187_v46 = vmul.f32 %v715_v45, %v174_v33  ;;  %v188_v48 = vmul.f32 %v715_v45, %v175_v34 }
 0x1a3   :  { %v189_v47 = vsel %vm157_vm3, %v187_v46, 0.0  ;;  %v192_v49 = vsel %vm159_vm4, %v188_v48, 0.0 }
 0x1a4   :  { %190 = vadd.xlane.f32.xlu1 %v189_v47 }
 0x1a8   :  { %193 = vadd.xlane.f32.xlu1 %v192_v49 }
 0x231   :  { %v191_v53 = vpop.xlane.xlu1 %190 }
 0x232   :  { %v196_v55 = vmul.f32 %v191_v53, %v800_v2  ;;  %v440_v2 = vld [vmem:[%s885_s9 + $0x8] sm:$0xff] }
 0x233   :  { %v699_v3 = vpack.c.bf16 %v440_v2, %v439_v1 }
 0x235   :  { %v194_v54 = vpop.xlane.xlu1 %193  ;;  %700 = vmatpush3.bf16.msra.mxu0 %v699_v3 }
 0x236   :  { %v197_v56 = vmul.f32 %v194_v54, %v810_v5  ;;  %v663_v5 = vpop.f32.mrb[3].mxu0  ;;  %701 = vmatprep.subr.bf16.mxu0 %v717_v50 }
 0x238   :  { %v692_v59 = vpack.c.bf16 %v197_v56, %v196_v55 }
 0x239   :  { %703 = vmatpush3.bf16.msra.mxu0 %v702_v8 }
 0x23a   :  { %694 = vmatpush3.bf16.msk.msra.mxu1 %vm693_vm9, %v692_v59 }
 0x23b   :  { %695 = vmatprep.subr.bf16.mxu1 %v717_v50 }
 0x23d   :  { %657 = vmatmul.mubr.msk.f32.vlgmr.msra.gmra.mrb[0].mxu1 %vm198_vm10, %v195_v60 }
 0x23e   :  { %697 = vmatpush3.bf16.msra.mxu1 %v696_v61  ;;  %668 = vmatprep.mubr.msk.f32.mxu1 %vm718_vm5, %v719_v51 }
 0x23f   :  { %682 = vmatprep.subr.mxu1 %v719_v51 }
 0x310   :  { %v272_v63 = vpop.f32.mrb[0].mxu1 }
 0x311   :  { %v658_v0 = vpop.f32.mrb[1].mxu1  ;;  %669 = vmatmul.mubr.msk.f32.vlgmr.msra.gmra.mrb[2].mxu1 %vm61_vm0, %v272_v63 }
 0x312   :  { %684 = vmatprep.mubr.msk.f32.mxu1 %vm718_vm5, %v719_v51  ;;  %683 = vmatpush3.msra.mxu1 %v525_v15 }
 0x3e4   :  { %v426_v9 = vpop.f32.mrb[2].mxu1 }
 0x3e5   :  { %v427_v11 = vadd.f32 %v426_v9, %v353_v4  ;;  %v670_v12 = vpop.f32.mrb[3].mxu1 }
 0x3e7   :  { %v437_v13 = vadd.f32 %v621_v10, %v427_v11 }
 0x3e9   :  { %v438_v14 = vmax.f32 %v437_v13, 0.0 }
 0x3eb   :  { %680 = vmatmul.mubr.msk.f32.vlgmr.msra.gmra.mrb[4].mxu0 %vm450_vm11, %v438_v14 }
 0x4be   :  { %v520_v18 = vpop.f32.mrb[4].mxu0 }
 0x4bf   :  { %v521_v19 = vadd.f32 %v622_v17, %v520_v18  ;;  %v681_v20 = vpop.f32.mrb[5].mxu0 }
 0x4c1   :  { %v524_v21 = vmax.f32 %v521_v19, 0.0 }
 0x4c3   :  { %685 = vmatmul.mubr.msk.f32.vlgmr.msra.gmra.mrb[4].mxu1 %vm533_vm12, %v524_v21 }
 0x596   :  { %v603_v23 = vpop.f32.mrb[4].mxu1 }
 0x597   :  { %v604_v24 = vadd.f32 %v624_v22, %v603_v23  ;;  %v686_v25 = vpop.f32.mrb[5].mxu1 }
 0x599   :  { %608 = vst.msk [vmem:[%s890_s13] sm:$0x3] %vm607_vm13, %v604_v24 }

</bundles_post_ra>
